<compile_context>
chip_gen: v6e
topology: v6e:2x2x1
jax: 0.10.0
libtpu: 0.0.40
codegen_flags: <defaults>
</compile_context>

<pallas_src>
import numpy as np
import jax
import jax.numpy as jnp
from jax import lax
from jax.experimental import pallas as pl
from jax.experimental.pallas import tpu as pltpu


# ----------------------------- scalar constants -----------------------------

K_HIGH_PRESSURE = 0.0244
K_LOW_PRESSURE = 0.0996
MLP_BIAS = 0.39306798577308655
KD_HP = 0.048828
KD_LP = 0.0097656

_LANES = 128
_OUT_LANES = 128
_N_FEATURES = 18
_N_OUTPUTS = 13


# ------------------------------- raw tables ---------------------------------

_CABIN_P1_MODENA = np.array(
    [[-20.0, 3.0], [-10.0, 2.0], [0.0, 0.88], [10.0, 0.38], [25.0, 0.7],
     [30.0, 1.0], [35.0, 1.31], [40.0, 2.5], [45.0, 3.0]], dtype=np.float32)

_TEMP_SET = np.array([18.0, 20.0, 22.0, 24.0, 26.0, 28.0, 30.0, 31.5, 32.0],
                     dtype=np.float32)

_TEMP_ENVR = np.array([-30.0, -20.0, -10.0, 0.0, 5.0, 10.0, 15.0, 20.0, 25.0,
                       30.0, 35.0, 40.0, 45.0, 50.0], dtype=np.float32)

_CABIN_SP = np.array(
    [[17.0, 17.0, 17.0, 17.0, 17.0, 17.0, 17.0, 17.0, 17.0, 17.0, 17.0, 17.0, 17.0, 17.0],
     [20.0, 20.0, 19.5, 19.5, 19.5, 19.0, 19.0, 19.0, 18.5, 18.5, 18.0, 18.0, 18.0, 18.0],
     [22.0, 22.0, 22.0, 22.5, 22.5, 22.5, 22.0, 22.0, 21.0, 21.0, 21.0, 21.0, 20.5, 20.0],
     [24.0, 24.5, 25.5, 25.5, 26.0, 26.0, 25.5, 25.0, 24.5, 24.0, 23.5, 23.0, 23.0, 23.0],
     [27.0, 26.5, 27.0, 27.5, 28.0, 28.0, 27.5, 27.0, 26.5, 26.0, 25.5, 26.0, 26.0, 26.0],
     [29.0, 28.5, 28.5, 29.5, 30.0, 30.0, 29.5, 29.0, 29.0, 29.0, 28.0, 28.0, 29.0, 29.0],
     [31.0, 30.5, 30.5, 31.5, 32.0, 32.0, 32.0, 31.0, 31.0, 31.0, 31.0, 31.0, 31.0, 31.0],
     [32.0, 32.0, 32.0, 33.0, 33.0, 33.0, 33.0, 33.0, 33.0, 33.0, 33.0, 33.0, 32.0, 32.0],
     [32.0, 32.0, 36.0, 36.0, 36.0, 36.0, 36.0, 36.0, 36.0, 36.0, 36.0, 36.0, 36.0, 36.0]],
    dtype=np.float32)

_CABIN_P2 = np.array(
    [[-20.0, 3.0], [-15.0, 2.0], [-10.0, 1.0], [-5.0, 0.5], [0.0, 0.4],
     [5.0, 0.5], [10.0, 1.5], [15.0, 3.0], [20.0, 6.0]], dtype=np.float32)

_CHILLER_P1_MODENA = np.array(
    [[-10.0, 4.0], [-5.0, 2.0], [-1.0, 1.0], [0.0, 0.4], [1.0, 0.4],
     [2.0, 0.4], [5.0, 1.0], [10.0, 2.0], [20.0, 3.0], [30.0, 4.0]],
    dtype=np.float32)

_EVAP_TEMP = np.array([[2.0, 1.0], [3.0, 10.0], [5.0, 50.0], [6.0, 500.0]],
                      dtype=np.float32)

_DIFFPRESS = np.array([-10.0, -2.5, -1.0, 1.0, 2.5, 10.0], dtype=np.float32)
_PID_KP_HP = np.array([0.5, 0.3417968, 0.3417968, 0.3417968, 0.3417968, 0.5],
                      dtype=np.float32)
_PID_KI_HP = np.array([0.1503906] * 6, dtype=np.float32)
_PID_KP_LP = np.array([0.49, 0.49, 0.05, 0.05, 0.49, 0.49], dtype=np.float32)
_PID_KI_LP = np.array([0.15, 0.13, 0.12, 0.06, 0.06, 0.09], dtype=np.float32)

_LO_PRESS = np.array([100.0, 150.0, 200.0, 250.0, 300.0, 350.0, 400.0, 450.0,
                      500.0, 550.0], dtype=np.float32)
_HI_PRESS = np.array([200.0, 400.0, 600.0, 800.0, 1000.0, 1200.0, 1400.0,
                      1600.0, 1800.0, 2000.0], dtype=np.float32)

_COM_SPEED_MIN_MODENA = np.array(
    [[2000.0, 2000.0, 2000.0, 2000.0, 2000.0, 2000.0, 2000.0, 2000.0, 2000.0, 2000.0],
     [1600.0, 1600.0, 1600.0, 1600.0, 1600.0, 1700.0, 1800.0, 1900.0, 2000.0, 2000.0],
     [1200.0, 1200.0, 1200.0, 1200.0, 1200.0, 1200.0, 1200.0, 1200.0, 1600.0, 2000.0],
     [900.0, 900.0, 950.0, 1000.0, 1050.0, 1100.0, 1150.0, 1200.0, 1600.0, 2000.0],
     [800.0, 800.0, 800.0, 800.0, 900.0, 1000.0, 1100.0, 1200.0, 1600.0, 2000.0],
     [800.0, 800.0, 800.0, 800.0, 800.0, 900.0, 1050.0, 1200.0, 1600.0, 2000.0],
     [800.0, 800.0, 800.0, 800.0, 800.0, 800.0, 1000.0, 1200.0, 1600.0, 2000.0],
     [800.0, 800.0, 800.0, 800.0, 800.0, 800.0, 950.0, 1200.0, 1600.0, 2000.0],
     [800.0, 800.0, 800.0, 800.0, 800.0, 800.0, 900.0, 1200.0, 1600.0, 2000.0],
     [800.0, 800.0, 800.0, 800.0, 800.0, 800.0, 850.0, 1200.0, 1600.0, 2000.0]],
    dtype=np.float32)

# modena uses com_speed_min_temp_amb_lemans_5
_COM_SPEED_MIN_TEMP_AMB = np.array([[10.0, 800.0], [15.0, 1000.0], [20.0, 1200.0]],
                                   dtype=np.float32)


# --------------------- host-side slab packing (divide-free) -----------------

class _SlabBuilder:
    """Packs named blocks into a (rows, 128) f32 slab; every block lane-0 aligned."""

    def __init__(self, lanes=_LANES):
        self.lanes = lanes
        self.rows = []
        self.index = {}          # name -> (row_start, n_rows, n_cols)

    def _alloc(self, name, nrows, ncols):
        assert ncols <= self.lanes
        r0 = len(self.rows)
        for _ in range(nrows):
            self.rows.append(np.zeros((self.lanes,), np.float32))
        self.index[name] = (r0, nrows, ncols)
        return r0

    def reserve(self, name, nrows, ncols):
        self._alloc(name, nrows, ncols)

    def add(self, name, arr):
        arr = np.asarray(arr, np.float32)
        if arr.ndim == 1:
            arr = arr[None, :]
        r0 = self._alloc(name, arr.shape[0], arr.shape[1])
        for i in range(arr.shape[0]):
            self.rows[r0 + i][:arr.shape[1]] = arr[i]

    def pad_to(self, m=8):
        while len(self.rows) % m:
            self.rows.append(np.zeros((self.lanes,), np.float32))

    def build(self):
        return np.stack(self.rows, axis=0)


def _padded_segments(x, y, nseg):
    """x0/x1/slope padded with degenerate (zero-contribution) segments + y[0]."""
    x = np.asarray(x, np.float32)
    y = np.asarray(y, np.float32)
    n = len(x) - 1
    assert n <= nseg
    x0 = np.full((nseg,), x[-1], np.float32)
    x1 = np.full((nseg,), x[-1], np.float32)
    sl = np.zeros((nseg,), np.float32)
    x0[:n] = x[:-1]
    x1[:n] = x[1:]
    sl[:n] = (y[1:] - y[:-1]) / (x[1:] - x[:-1])
    return x0, x1, sl, np.float32(y[0])


# 7 input-only 1-D tables evaluated in one batched pass (row order == query order)
_I7_TABLES = (
    (_CABIN_P1_MODENA[:, 0], _CABIN_P1_MODENA[:, 1]),                  # temp_amb
    (_CHILLER_P1_MODENA[:, 0], _CHILLER_P1_MODENA[:, 1]),              # chiller_err
    (_DIFFPRESS, _PID_KP_HP),                                          # diff_hi
    (_DIFFPRESS, _PID_KI_HP),                                          # diff_hi
    (_DIFFPRESS, _PID_KP_LP),                                          # diff_lo
    (_DIFFPRESS, _PID_KI_LP),                                          # diff_lo
    (_COM_SPEED_MIN_TEMP_AMB[:, 0], _COM_SPEED_MIN_TEMP_AMB[:, 1]),    # amb_lim
)
_I7_NSEG = 9


def _build_base_slab():
    b = _SlabBuilder()

    # --- MLP1 parameters (filled from runtime params in build_slab) ---
    b.reserve("w2", 64, 64)        # (in, out)
    b.reserve("w1r0", 1, 64)       # W1 row for input 0 (kprate_cabin)
    b.reserve("w1r1", 1, 64)       # W1 row for input 1 (kprate_chiller)
    b.reserve("b1", 1, 64)
    b.reserve("b2", 1, 64)
    b.reserve("w3", 1, 64)
    b.reserve("b3", 1, 1)

    # --- batched 1-D tables (7 rows, 9 segments each) ---
    x0s, x1s, sls, y0s = [], [], [], []
    for xs, ys in _I7_TABLES:
        x0, x1, sl, y0 = _padded_segments(xs, ys, _I7_NSEG)
        x0s.append(x0); x1s.append(x1); sls.append(sl); y0s.append(y0)
    b.add("i7_x0", np.stack(x0s))
    b.add("i7_x1", np.stack(x1s))
    b.add("i7_sl", np.stack(sls))
    b.add("i7_y0", np.asarray(y0s, np.float32)[:, None])

    # --- result-dependent 1-D tables: cab2 (dvt_err) and evap (temp_evap) ---
    for name, (xs, ys) in (("cab2", (_CABIN_P2[:, 0], _CABIN_P2[:, 1])),
                           ("evap", (_EVAP_TEMP[:, 0], _EVAP_TEMP[:, 1]))):
        nseg = len(xs) - 1
        x0, x1, sl, y0 = _padded_segments(xs, ys, nseg)
        b.add(name + "_x0", x0)
        b.add(name + "_x1", x1)
        b.add(name + "_sl", sl)
        b.add(name + "_y0", np.asarray([y0], np.float32))

    # --- cabin set-point 2-D table (temp_set rows x temp_envr cols) ---
    d_env = np.diff(_TEMP_ENVR)
    d_set = np.diff(_TEMP_SET)
    b.add("sp_slope_env", np.diff(_CABIN_SP, axis=1) / d_env[None, :])   # (9,13)
    b.add("sp_col0", _CABIN_SP[:, :1])                                    # (9,1)
    b.add("sp_env0", _TEMP_ENVR[:-1])                                     # (1,13)
    b.add("sp_env1", _TEMP_ENVR[1:])                                      # (1,13)
    b.add("sp_set0", _TEMP_SET[:-1, None])                                # (8,1)
    b.add("sp_set1", _TEMP_SET[1:, None])                                 # (8,1)
    b.add("sp_invd", (1.0 / d_set)[:, None])                              # (8,1)

    # --- compressor min-speed 2-D table (lo_press rows x hi_press cols) ---
    d_lo = np.diff(_LO_PRESS)
    d_hi = np.diff(_HI_PRESS)
    b.add("csm_slope_lo", np.diff(_COM_SPEED_MIN_MODENA, axis=0) / d_lo[:, None])  # (9,10)
    b.add("csm_lo0", _LO_PRESS[:-1, None])                                # (9,1)
    b.add("csm_lo1", _LO_PRESS[1:, None])                                 # (9,1)
    b.add("csm_row0", _COM_SPEED_MIN_MODENA[0, :])                        # (1,10)
    b.add("csm_hi0", _HI_PRESS[:-1])                                      # (1,9)
    b.add("csm_hi1", _HI_PRESS[1:])                                       # (1,9)
    b.add("csm_invdhi", 1.0 / d_hi)                                       # (1,9)

    b.pad_to(8)
    return b.index, b.build()


_SLAB_INDEX, _SLAB_BASE = _build_base_slab()
_SLAB_ROWS = _SLAB_BASE.shape[0]            # 184


# --------------------------- in-kernel helpers --------------------------------

def _rows(slab_ref, name):
    """Load one named lane-0-aligned row range directly from the slab ref."""
    r0, nr, nc = _SLAB_INDEX[name]
    return slab_ref[r0:r0 + nr, 0:nc]


def _interp1d_row(slab_ref, prefix, q):
    """Divide-free clamped piecewise-linear interp; q: (1,1) -> (1,1)."""
    x0 = _rows(slab_ref, prefix + "_x0")
    x1 = _rows(slab_ref, prefix + "_x1")
    sl = _rows(slab_ref, prefix + "_sl")
    y0 = _rows(slab_ref, prefix + "_y0")
    return y0 + jnp.sum(sl * (jnp.clip(q, x0, x1) - x0), axis=1, keepdims=True)


# ----------------------------------- kernel -----------------------------------

def _ac_pid_kernel(x_ref, slab_ref, out_ref):
    # --- scalar feature reads from SMEM (no lane slices on the critical path) ---
    last_pid = x_ref[0]
    temp_amb = x_ref[1]
    cab_fl_set = x_ref[2]
    cab_fr_set = x_ref[3]
    lo_pressure = x_ref[4]
    hi_pressure = x_ref[5]
    aim_lo = x_ref[6]
    aim_hi = x_ref[7]
    temp_incar = x_ref[8]
    temp_batt_req = x_ref[9]
    temp_cool_in = x_ref[10]
    temp_evap = x_ref[15]
    hp_mode_ac = x_ref[16]
    cab_cool_pos = x_ref[17]

    diff_hi = (aim_hi - hi_pressure) * K_HIGH_PRESSURE
    diff_lo = (lo_pressure - aim_lo) * K_LOW_PRESSURE
    chiller_err = temp_batt_req - temp_cool_in
    amb_lim = jnp.minimum(jnp.maximum(temp_amb, 10.0), 20.0)

    # --- 7 independent 1-D interps: one clip+mul over (7,9), ONE lane reduce ---
    srow = lax.broadcasted_iota(jnp.int32, (7, 1), 0)

    def oh(i, v):
        return jnp.where(srow == i, v, 0.0)

    q7 = ((oh(0, temp_amb) + oh(1, chiller_err))
          + (oh(2, diff_hi) + oh(3, diff_hi))
          + ((oh(4, diff_lo) + oh(5, diff_lo)) + oh(6, amb_lim)))          # (7,1)
    i7_x0 = _rows(slab_ref, "i7_x0")
    i7_x1 = _rows(slab_ref, "i7_x1")
    i7_sl = _rows(slab_ref, "i7_sl")
    r7 = _rows(slab_ref, "i7_y0") + jnp.sum(
        i7_sl * (jnp.clip(q7, i7_x0, i7_x1) - i7_x0), axis=1, keepdims=True)  # (7,1)

    kprate_cab1 = r7[0:1, :]
    kprate_chiller = r7[1:2, :]
    kp_hp_raw = r7[2:3, :]
    ki_hp_raw = r7[3:4, :]
    kp_lp_raw = r7[4:5, :]
    ki_lp_raw = r7[5:6, :]
    csm2 = r7[6:7, :]

    # --- CabinSP 2-D lookup; FL / FR queries share the temp_envr pass ---
    # TODO(synk): reference inter1D/inter2D edge behaviour assumed to be flat
    #             (clamped) extrapolation outside the table range.
    slope_env = _rows(slab_ref, "sp_slope_env")                           # (9,13)
    env0 = _rows(slab_ref, "sp_env0")
    env1 = _rows(slab_ref, "sp_env1")
    col_vals = _rows(slab_ref, "sp_col0") + jnp.sum(
        slope_env * (jnp.clip(temp_amb, env0, env1) - env0),
        axis=1, keepdims=True)                                            # (9,1)
    set0 = _rows(slab_ref, "sp_set0")                                     # (8,1)
    set1 = _rows(slab_ref, "sp_set1")
    slope_set = (col_vals[1:9, :] - col_vals[0:8, :]) * _rows(slab_ref, "sp_invd")
    lane2 = lax.broadcasted_iota(jnp.int32, (1, 2), 1)
    q_set = jnp.where(lane2 == 0, cab_fl_set, cab_fr_set)                 # (1,2)
    sp_flfr = col_vals[0:1, :] + jnp.sum(
        slope_set * (jnp.clip(q_set, set0, set1) - set0),
        axis=0, keepdims=True)                                            # (1,2)
    dvt_err = jnp.min(sp_flfr, axis=1, keepdims=True) - temp_incar        # (1,1)

    kprate_cab2 = _interp1d_row(slab_ref, "cab2", dvt_err)
    kprate_cabin = jnp.minimum(kprate_cab1, kprate_cab2)                  # (1,1)

    # --- MLP1: 2 -> 64 -> 64 -> 1 (tanh); lane-dense activations, MXU 64x64 ---
    h1 = jnp.tanh(kprate_cabin * _rows(slab_ref, "w1r0")
                  + kprate_chiller * _rows(slab_ref, "w1r1")
                  + _rows(slab_ref, "b1"))                                # (1,64)
    h2 = jnp.tanh(jnp.dot(h1, _rows(slab_ref, "w2"),
                          preferred_element_type=jnp.float32)
                  + _rows(slab_ref, "b2"))                                # (1,64)
    mlp_out = jnp.sum(h2 * _rows(slab_ref, "w3"), axis=1, keepdims=True) \
        + _rows(slab_ref, "b3")
    ac_kprate = mlp_out + MLP_BIAS                                        # (1,1)

    # --- PID gains ---
    kp_hp = kp_hp_raw * ac_kprate
    ki_hp = ki_hp_raw * ac_kprate
    kd_hp = KD_HP * ac_kprate
    kp_lp = kp_lp_raw * ac_kprate
    ki_lp = ki_lp_raw * ac_kprate
    kd_lp = KD_LP * ac_kprate

    # --- compressor minimum speed (2-D lookup + ambient 1-D lookup) ---
    slope_lo = _rows(slab_ref, "csm_slope_lo")                            # (9,10)
    lo0 = _rows(slab_ref, "csm_lo0")
    lo1 = _rows(slab_ref, "csm_lo1")
    row_at_lo = _rows(slab_ref, "csm_row0") + jnp.sum(
        slope_lo * (jnp.clip(lo_pressure, lo0, lo1) - lo0),
        axis=0, keepdims=True)                                            # (1,10)
    hi0 = _rows(slab_ref, "csm_hi0")
    hi1 = _rows(slab_ref, "csm_hi1")
    slope_hi = (row_at_lo[:, 1:10] - row_at_lo[:, 0:9]) * _rows(slab_ref, "csm_invdhi")
    csm1 = row_at_lo[:, 0:1] + jnp.sum(
        slope_hi * (jnp.clip(hi_pressure, hi0, hi1) - hi0),
        axis=1, keepdims=True)                                            # (1,1)
    com_speed_min = jnp.maximum(csm1, csm2)

    # --- PID terms (persistent Ivalue / last_Pout / last_Dout == 0 at init) ---
    abs_hi = jnp.maximum(diff_hi, -diff_hi)
    abs_lo = jnp.maximum(diff_lo, -diff_lo)
    ivalue_hp = jnp.where(abs_hi < 0.39063, 0.0, diff_hi * 0.5)           # scalar
    ivalue_lp = jnp.where(abs_lo < 0.59375, 0.0, diff_lo * 0.5)
    iout_hp = ki_hp * (ivalue_hp * 0.5)
    pout_hp = kp_hp * diff_hi
    diffout_hp = pout_hp            # + Dout - (last_Pout + last_Dout) == Pout
    hp_ad = iout_hp + diffout_hp
    iout_lp = ki_lp * (ivalue_lp * 0.5)
    pout_lp = kp_lp * diff_lo
    diffout_lp = pout_lp
    lp_ad = iout_lp + diffout_lp

    offset = jnp.where(hp_ad <= lp_ad, hp_ad, lp_ad) * 85.0

    # --- rate limiting ---
    cond_near_min = (last_pid + 100.0) > com_speed_min                    # (1,1)
    cond_cooling = jnp.logical_and(cab_cool_pos > 0.0, hp_mode_ac > 0.0)  # scalar
    evap_up = jnp.maximum(_interp1d_row(slab_ref, "evap", temp_evap), 1.0)
    evap_up = jnp.where(cond_cooling, evap_up, 200.0)
    max_up_true = jnp.minimum(jnp.minimum(200.0, ac_kprate * 78.0),
                              jnp.minimum(500.0, evap_up))
    max_up = jnp.where(cond_near_min, max_up_true, 8500.0)
    max_down = jnp.where(cond_near_min, -200.0, -8500.0)
    offset = jnp.clip(offset, max_down, max_up)

    ac_pid = last_pid + offset
    csm_eff = jnp.where(ac_pid < com_speed_min - 120.0, 800.0, com_speed_min)
    ac_pid_c = jnp.clip(ac_pid, csm_eff, 8000.0)
    last_offset = ac_pid_c - last_pid
    ac_pid_out = jnp.where(last_offset >= 800.0, last_pid, ac_pid_c)

    # --- lane-dense output: disjoint one-hot masks + balanced add tree ---
    outs = (ac_pid_out, kp_hp, ki_hp, kd_hp, iout_hp, diffout_hp, hp_ad,
            kp_lp, ki_lp, kd_lp, iout_lp, diffout_lp, lp_ad)
    lane = lax.broadcasted_iota(jnp.int32, (1, _OUT_LANES), 1)
    terms = [jnp.where(lane == i, v, 0.0) for i, v in enumerate(outs)]
    while len(terms) > 1:
        nxt = [terms[i] + terms[i + 1] for i in range(0, len(terms) - 1, 2)]
        if len(terms) % 2:
            nxt.append(terms[-1])
        terms = nxt
    out_ref[...] = terms[0]


# ----------------------------------- wrapper -----------------------------------

def init_params(seed=0):
    """Deterministic xavier-uniform weights / zero biases for MLP1 (2->64->64->1)."""
    key = jax.random.PRNGKey(seed)
    k1, k2, k3 = jax.random.split(key, 3)

    def xavier(k, fan_in, fan_out, shape):
        limit = np.sqrt(6.0 / (fan_in + fan_out)).astype(np.float32)
        return jax.random.uniform(k, shape, jnp.float32, -limit, limit)

    return {
        "w1": xavier(k1, 2, 64, (2, 64)),       # stored (in, out)
        "b1": jnp.zeros((1, 64), jnp.float32),
        "w2": xavier(k2, 64, 64, (64, 64)),     # stored (in, out)
        "b2": jnp.zeros((1, 64), jnp.float32),
        "w3": xavier(k3, 64, 1, (1, 64)),       # last-layer weight as a row
        "b3": jnp.zeros((1, 1), jnp.float32),
    }


def build_slab(params):
    """Pack MLP parameters + precomputed interpolation tables into one slab.

    Built once host-side; passed as a single (184, 128) f32 operand."""
    slab = np.array(_SLAB_BASE, copy=True)

    def put(name, arr):
        r0, nr, nc = _SLAB_INDEX[name]
        slab[r0:r0 + nr, 0:nc] = np.asarray(arr, np.float32).reshape(nr, nc)

    w1 = np.asarray(params["w1"], np.float32)        # (2, 64)
    put("w2", params["w2"])
    put("w1r0", w1[0])
    put("w1r1", w1[1])
    put("b1", params["b1"])
    put("b2", params["b2"])
    put("w3", params["w3"])
    put("b3", params["b3"])
    return jnp.asarray(slab)


@jax.jit
def _forward(x, slab):
    x_s = x.reshape((_N_FEATURES,))
    out = pl.pallas_call(
        _ac_pid_kernel,
        out_shape=jax.ShapeDtypeStruct((1, _OUT_LANES), jnp.float32),
        in_specs=[pl.BlockSpec(memory_space=pltpu.MemorySpace.SMEM),
                  pl.BlockSpec(memory_space=pltpu.MemorySpace.VMEM)],
        out_specs=pl.BlockSpec(memory_space=pltpu.MemorySpace.VMEM),
    )(x_s, slab)
    return out[:, :_N_OUTPUTS]


def my_model_forward(x, slab):
    """x: (1, 18) float32 feature row; slab from build_slab().  Returns (1, 13)."""
    x = jnp.asarray(x, jnp.float32).reshape(1, -1)
    assert x.shape == (1, _N_FEATURES), "this controller forward supports batch == 1"
    return _forward(x, slab)


# ------------------------------------- main ------------------------------------

if __name__ == "__main__":
    params = init_params(seed=0)
    slab = build_slab(params)

    # Plausible controller inputs (18 features), deterministically jittered.
    base = jnp.array([[3000.0,   # last_ac_pid_out_hp
                       30.0,     # temp_amb
                       24.0,     # cab_fl_set_temp
                       26.0,     # cab_fr_set_temp
                       300.0,    # lo_pressure
                       1200.0,   # hi_pressure
                       280.0,    # aim_lo_pressure
                       1400.0,   # aim_hi_pressure
                       28.0,     # temp_incar
                       20.0,     # temp_battery_req
                       25.0,     # temp_coolant_battery_in
                       1.0,      # ac_kp_rate_last (unused)
                       40.0,     # temp_p_h_2 (unused)
                       0.0, 0.0,  # unused slots 13, 14
                       8.0,      # temp_evap
                       1.0,      # hp_mode_ac
                       1.0]],    # cab_cooling_status_act_pos
                     dtype=jnp.float32)
    noise = 0.1 * jax.random.normal(jax.random.PRNGKey(0), base.shape,
                                    dtype=jnp.float32)
    x = base + noise

    out = my_model_forward(x, slab)
    out = jax.block_until_ready(out)
    assert out.shape == (1, _N_OUTPUTS)
    assert bool(jnp.all(jnp.isfinite(out)))
    print("KERNEL_OK")
</pallas_src>

<mosaic_0001>
module attributes {stable_mosaic.version = 11 : i64} {
  func.func @_ac_pid_kernel(%arg0: memref<18xf32, #tpu.memory_space<smem>>, %arg1: memref<184x128xf32, #tpu.memory_space<vmem>>, %arg2: memref<1x128xf32, #tpu.memory_space<vmem>>) attributes {dimension_semantics = [], scalar_prefetch = 0 : i64, scratch_operands = 0 : i64, tpu.core_type = #tpu.core_type<tc>} {
    %c0 = arith.constant 0 : index
    %0 = memref.load %arg0[%c0] : memref<18xf32, #tpu.memory_space<smem>>
    %c1 = arith.constant 1 : index
    %1 = memref.load %arg0[%c1] : memref<18xf32, #tpu.memory_space<smem>>
    %c2 = arith.constant 2 : index
    %2 = memref.load %arg0[%c2] : memref<18xf32, #tpu.memory_space<smem>>
    %c3 = arith.constant 3 : index
    %3 = memref.load %arg0[%c3] : memref<18xf32, #tpu.memory_space<smem>>
    %c4 = arith.constant 4 : index
    %4 = memref.load %arg0[%c4] : memref<18xf32, #tpu.memory_space<smem>>
    %c5 = arith.constant 5 : index
    %5 = memref.load %arg0[%c5] : memref<18xf32, #tpu.memory_space<smem>>
    %c6 = arith.constant 6 : index
    %6 = memref.load %arg0[%c6] : memref<18xf32, #tpu.memory_space<smem>>
    %c7 = arith.constant 7 : index
    %7 = memref.load %arg0[%c7] : memref<18xf32, #tpu.memory_space<smem>>
    %c8 = arith.constant 8 : index
    %8 = memref.load %arg0[%c8] : memref<18xf32, #tpu.memory_space<smem>>
    %c9 = arith.constant 9 : index
    %9 = memref.load %arg0[%c9] : memref<18xf32, #tpu.memory_space<smem>>
    %c10 = arith.constant 10 : index
    %10 = memref.load %arg0[%c10] : memref<18xf32, #tpu.memory_space<smem>>
    %c15 = arith.constant 15 : index
    %11 = memref.load %arg0[%c15] : memref<18xf32, #tpu.memory_space<smem>>
    %c16 = arith.constant 16 : index
    %12 = memref.load %arg0[%c16] : memref<18xf32, #tpu.memory_space<smem>>
    %c17 = arith.constant 17 : index
    %13 = memref.load %arg0[%c17] : memref<18xf32, #tpu.memory_space<smem>>
    %14 = arith.subf %7, %5 : f32
    %cst = arith.constant 2.440000e-02 : f32
    %15 = arith.mulf %14, %cst : f32
    %16 = arith.subf %4, %6 : f32
    %cst_0 = arith.constant 9.960000e-02 : f32
    %17 = arith.mulf %16, %cst_0 : f32
    %18 = arith.subf %9, %10 : f32
    %cst_1 = arith.constant 1.000000e+01 : f32
    %19 = arith.maximumf %1, %cst_1 : f32
    %cst_2 = arith.constant 2.000000e+01 : f32
    %20 = arith.minimumf %19, %cst_2 : f32
    %21 = tpu.iota {dimensions = array<i32: 0>} : vector<7x1xi32>
    %c0_i32 = arith.constant 0 : i32
    %22 = vector.broadcast %c0_i32 : i32 to vector<7x1xi32>
    %23 = arith.cmpi eq, %21, %22 : vector<7x1xi32>
    %cst_3 = arith.constant 0.000000e+00 : f32
    %24 = vector.broadcast %1 : f32 to vector<7x1xf32>
    %25 = vector.broadcast %cst_3 : f32 to vector<7x1xf32>
    %26 = arith.select %23, %24, %25 : vector<7x1xi1>, vector<7x1xf32>
    %c1_i32 = arith.constant 1 : i32
    %27 = vector.broadcast %c1_i32 : i32 to vector<7x1xi32>
    %28 = arith.cmpi eq, %21, %27 : vector<7x1xi32>
    %cst_4 = arith.constant 0.000000e+00 : f32
    %29 = vector.broadcast %18 : f32 to vector<7x1xf32>
    %30 = vector.broadcast %cst_4 : f32 to vector<7x1xf32>
    %31 = arith.select %28, %29, %30 : vector<7x1xi1>, vector<7x1xf32>
    %32 = arith.addf %26, %31 : vector<7x1xf32>
    %c2_i32 = arith.constant 2 : i32
    %33 = vector.broadcast %c2_i32 : i32 to vector<7x1xi32>
    %34 = arith.cmpi eq, %21, %33 : vector<7x1xi32>
    %cst_5 = arith.constant 0.000000e+00 : f32
    %35 = vector.broadcast %15 : f32 to vector<7x1xf32>
    %36 = vector.broadcast %cst_5 : f32 to vector<7x1xf32>
    %37 = arith.select %34, %35, %36 : vector<7x1xi1>, vector<7x1xf32>
    %c3_i32 = arith.constant 3 : i32
    %38 = vector.broadcast %c3_i32 : i32 to vector<7x1xi32>
    %39 = arith.cmpi eq, %21, %38 : vector<7x1xi32>
    %cst_6 = arith.constant 0.000000e+00 : f32
    %40 = vector.broadcast %15 : f32 to vector<7x1xf32>
    %41 = vector.broadcast %cst_6 : f32 to vector<7x1xf32>
    %42 = arith.select %39, %40, %41 : vector<7x1xi1>, vector<7x1xf32>
    %43 = arith.addf %37, %42 : vector<7x1xf32>
    %44 = arith.addf %32, %43 : vector<7x1xf32>
    %c4_i32 = arith.constant 4 : i32
    %45 = vector.broadcast %c4_i32 : i32 to vector<7x1xi32>
    %46 = arith.cmpi eq, %21, %45 : vector<7x1xi32>
    %cst_7 = arith.constant 0.000000e+00 : f32
    %47 = vector.broadcast %17 : f32 to vector<7x1xf32>
    %48 = vector.broadcast %cst_7 : f32 to vector<7x1xf32>
    %49 = arith.select %46, %47, %48 : vector<7x1xi1>, vector<7x1xf32>
    %c5_i32 = arith.constant 5 : i32
    %50 = vector.broadcast %c5_i32 : i32 to vector<7x1xi32>
    %51 = arith.cmpi eq, %21, %50 : vector<7x1xi32>
    %cst_8 = arith.constant 0.000000e+00 : f32
    %52 = vector.broadcast %17 : f32 to vector<7x1xf32>
    %53 = vector.broadcast %cst_8 : f32 to vector<7x1xf32>
    %54 = arith.select %51, %52, %53 : vector<7x1xi1>, vector<7x1xf32>
    %55 = arith.addf %49, %54 : vector<7x1xf32>
    %c6_i32 = arith.constant 6 : i32
    %56 = vector.broadcast %c6_i32 : i32 to vector<7x1xi32>
    %57 = arith.cmpi eq, %21, %56 : vector<7x1xi32>
    %cst_9 = arith.constant 0.000000e+00 : f32
    %58 = vector.broadcast %20 : f32 to vector<7x1xf32>
    %59 = vector.broadcast %cst_9 : f32 to vector<7x1xf32>
    %60 = arith.select %57, %58, %59 : vector<7x1xi1>, vector<7x1xf32>
    %61 = arith.addf %55, %60 : vector<7x1xf32>
    %62 = arith.addf %44, %61 : vector<7x1xf32>
    %c70 = arith.constant 70 : index
    %c0_10 = arith.constant 0 : index
    %63 = vector.load %arg1[%c70, %c0_10] : memref<184x128xf32, #tpu.memory_space<vmem>>, vector<7x9xf32>
    %c77 = arith.constant 77 : index
    %c0_11 = arith.constant 0 : index
    %64 = vector.load %arg1[%c77, %c0_11] : memref<184x128xf32, #tpu.memory_space<vmem>>, vector<7x9xf32>
    %c84 = arith.constant 84 : index
    %c0_12 = arith.constant 0 : index
    %65 = vector.load %arg1[%c84, %c0_12] : memref<184x128xf32, #tpu.memory_space<vmem>>, vector<7x9xf32>
    %c91 = arith.constant 91 : index
    %c0_13 = arith.constant 0 : index
    %66 = vector.load %arg1[%c91, %c0_13] : memref<184x128xf32, #tpu.memory_space<vmem>>, vector<7x1xf32>
    %67 = vector.broadcast %62 : vector<7x1xf32> to vector<7x9xf32>
    %68 = arith.maximumf %63, %67 : vector<7x9xf32>
    %69 = arith.minimumf %64, %68 : vector<7x9xf32>
    %70 = arith.subf %69, %63 : vector<7x9xf32>
    %71 = arith.mulf %65, %70 : vector<7x9xf32>
    %cst_14 = arith.constant dense<0.000000e+00> : vector<7xf32>
    %72 = vector.multi_reduction <add>, %71, %cst_14 [1] : vector<7x9xf32> to vector<7xf32>
    %73 = vector.shape_cast %72 : vector<7xf32> to vector<7x1xf32>
    %74 = arith.addf %66, %73 : vector<7x1xf32>
    %75 = vector.extract_strided_slice %74 {offsets = [0, 0], sizes = [1, 1], strides = [1, 1]} : vector<7x1xf32> to vector<1x1xf32>
    %76 = vector.extract_strided_slice %74 {offsets = [1, 0], sizes = [1, 1], strides = [1, 1]} : vector<7x1xf32> to vector<1x1xf32>
    %77 = vector.extract_strided_slice %74 {offsets = [2, 0], sizes = [1, 1], strides = [1, 1]} : vector<7x1xf32> to vector<1x1xf32>
    %78 = vector.extract_strided_slice %74 {offsets = [3, 0], sizes = [1, 1], strides = [1, 1]} : vector<7x1xf32> to vector<1x1xf32>
    %79 = vector.extract_strided_slice %74 {offsets = [4, 0], sizes = [1, 1], strides = [1, 1]} : vector<7x1xf32> to vector<1x1xf32>
    %80 = vector.extract_strided_slice %74 {offsets = [5, 0], sizes = [1, 1], strides = [1, 1]} : vector<7x1xf32> to vector<1x1xf32>
    %81 = vector.extract_strided_slice %74 {offsets = [6, 0], sizes = [1, 1], strides = [1, 1]} : vector<7x1xf32> to vector<1x1xf32>
    %c106 = arith.constant 106 : index
    %c0_15 = arith.constant 0 : index
    %82 = vector.load %arg1[%c106, %c0_15] : memref<184x128xf32, #tpu.memory_space<vmem>>, vector<9x13xf32>
    %c124 = arith.constant 124 : index
    %c0_16 = arith.constant 0 : index
    %83 = vector.load %arg1[%c124, %c0_16] : memref<184x128xf32, #tpu.memory_space<vmem>>, vector<1x13xf32>
    %c125 = arith.constant 125 : index
    %c0_17 = arith.constant 0 : index
    %84 = vector.load %arg1[%c125, %c0_17] : memref<184x128xf32, #tpu.memory_space<vmem>>, vector<1x13xf32>
    %c115 = arith.constant 115 : index
    %c0_18 = arith.constant 0 : index
    %85 = vector.load %arg1[%c115, %c0_18] : memref<184x128xf32, #tpu.memory_space<vmem>>, vector<9x1xf32>
    %86 = vector.broadcast %1 : f32 to vector<1x13xf32>
    %87 = arith.maximumf %83, %86 : vector<1x13xf32>
    %88 = arith.minimumf %84, %87 : vector<1x13xf32>
    %89 = arith.subf %88, %83 : vector<1x13xf32>
    %90 = vector.broadcast %89 : vector<1x13xf32> to vector<9x13xf32>
    %91 = arith.mulf %82, %90 : vector<9x13xf32>
    %cst_19 = arith.constant dense<0.000000e+00> : vector<9xf32>
    %92 = vector.multi_reduction <add>, %91, %cst_19 [1] : vector<9x13xf32> to vector<9xf32>
    %93 = vector.shape_cast %92 : vector<9xf32> to vector<9x1xf32>
    %94 = arith.addf %85, %93 : vector<9x1xf32>
    %c126 = arith.constant 126 : index
    %c0_20 = arith.constant 0 : index
    %95 = vector.load %arg1[%c126, %c0_20] : memref<184x128xf32, #tpu.memory_space<vmem>>, vector<8x1xf32>
    %c134 = arith.constant 134 : index
    %c0_21 = arith.constant 0 : index
    %96 = vector.load %arg1[%c134, %c0_21] : memref<184x128xf32, #tpu.memory_space<vmem>>, vector<8x1xf32>
    %97 = vector.extract_strided_slice %94 {offsets = [1, 0], sizes = [8, 1], strides = [1, 1]} : vector<9x1xf32> to vector<8x1xf32>
    %98 = vector.extract_strided_slice %94 {offsets = [0, 0], sizes = [8, 1], strides = [1, 1]} : vector<9x1xf32> to vector<8x1xf32>
    %99 = arith.subf %97, %98 : vector<8x1xf32>
    %c142 = arith.constant 142 : index
    %c0_22 = arith.constant 0 : index
    %100 = vector.load %arg1[%c142, %c0_22] : memref<184x128xf32, #tpu.memory_space<vmem>>, vector<8x1xf32>
    %101 = arith.mulf %99, %100 : vector<8x1xf32>
    %102 = tpu.iota {dimensions = array<i32: 1>} : vector<1x2xi32>
    %c0_i32_23 = arith.constant 0 : i32
    %103 = vector.broadcast %c0_i32_23 : i32 to vector<1x2xi32>
    %104 = arith.cmpi eq, %102, %103 : vector<1x2xi32>
    %105 = vector.broadcast %2 : f32 to vector<1x2xf32>
    %106 = vector.broadcast %3 : f32 to vector<1x2xf32>
    %107 = arith.select %104, %105, %106 : vector<1x2xi1>, vector<1x2xf32>
    %108 = vector.extract_strided_slice %94 {offsets = [0, 0], sizes = [1, 1], strides = [1, 1]} : vector<9x1xf32> to vector<1x1xf32>
    %109 = vector.broadcast %95 : vector<8x1xf32> to vector<8x2xf32>
    %110 = vector.broadcast %107 : vector<1x2xf32> to vector<8x2xf32>
    %111 = arith.maximumf %109, %110 : vector<8x2xf32>
    %112 = vector.broadcast %96 : vector<8x1xf32> to vector<8x2xf32>
    %113 = arith.minimumf %112, %111 : vector<8x2xf32>
    %114 = vector.broadcast %95 : vector<8x1xf32> to vector<8x2xf32>
    %115 = arith.subf %113, %114 : vector<8x2xf32>
    %116 = vector.broadcast %101 : vector<8x1xf32> to vector<8x2xf32>
    %117 = arith.mulf %116, %115 : vector<8x2xf32>
    %cst_24 = arith.constant dense<0.000000e+00> : vector<2xf32>
    %118 = vector.multi_reduction <add>, %117, %cst_24 [0] : vector<8x2xf32> to vector<2xf32>
    %119 = vector.shape_cast %118 : vector<2xf32> to vector<1x2xf32>
    %120 = vector.broadcast %108 : vector<1x1xf32> to vector<1x2xf32>
    %121 = arith.addf %120, %119 : vector<1x2xf32>
    %cst_25 = arith.constant dense<0x7F800000> : vector<1xf32>
    %122 = vector.multi_reduction <minimumf>, %121, %cst_25 [1] : vector<1x2xf32> to vector<1xf32>
    %123 = vector.shape_cast %122 : vector<1xf32> to vector<1x1xf32>
    %124 = vector.broadcast %8 : f32 to vector<1x1xf32>
    %125 = arith.subf %123, %124 : vector<1x1xf32>
    %c98 = arith.constant 98 : index
    %c0_26 = arith.constant 0 : index
    %126 = vector.load %arg1[%c98, %c0_26] : memref<184x128xf32, #tpu.memory_space<vmem>>, vector<1x8xf32>
    %c99 = arith.constant 99 : index
    %c0_27 = arith.constant 0 : index
    %127 = vector.load %arg1[%c99, %c0_27] : memref<184x128xf32, #tpu.memory_space<vmem>>, vector<1x8xf32>
    %c100 = arith.constant 100 : index
    %c0_28 = arith.constant 0 : index
    %128 = vector.load %arg1[%c100, %c0_28] : memref<184x128xf32, #tpu.memory_space<vmem>>, vector<1x8xf32>
    %c101 = arith.constant 101 : index
    %c0_29 = arith.constant 0 : index
    %129 = vector.load %arg1[%c101, %c0_29] : memref<184x128xf32, #tpu.memory_space<vmem>>, vector<1x1xf32>
    %130 = vector.broadcast %125 : vector<1x1xf32> to vector<1x8xf32>
    %131 = arith.maximumf %126, %130 : vector<1x8xf32>
    %132 = arith.minimumf %127, %131 : vector<1x8xf32>
    %133 = arith.subf %132, %126 : vector<1x8xf32>
    %134 = arith.mulf %128, %133 : vector<1x8xf32>
    %cst_30 = arith.constant dense<0.000000e+00> : vector<1xf32>
    %135 = vector.multi_reduction <add>, %134, %cst_30 [1] : vector<1x8xf32> to vector<1xf32>
    %136 = vector.shape_cast %135 : vector<1xf32> to vector<1x1xf32>
    %137 = arith.addf %129, %136 : vector<1x1xf32>
    %138 = arith.minimumf %75, %137 : vector<1x1xf32>
    %c64 = arith.constant 64 : index
    %c0_31 = arith.constant 0 : index
    %139 = vector.load %arg1[%c64, %c0_31] : memref<184x128xf32, #tpu.memory_space<vmem>>, vector<1x64xf32>
    %140 = vector.broadcast %138 : vector<1x1xf32> to vector<1x64xf32>
    %141 = arith.mulf %140, %139 : vector<1x64xf32>
    %c65 = arith.constant 65 : index
    %c0_32 = arith.constant 0 : index
    %142 = vector.load %arg1[%c65, %c0_32] : memref<184x128xf32, #tpu.memory_space<vmem>>, vector<1x64xf32>
    %143 = vector.broadcast %76 : vector<1x1xf32> to vector<1x64xf32>
    %144 = arith.mulf %143, %142 : vector<1x64xf32>
    %145 = arith.addf %141, %144 : vector<1x64xf32>
    %c66 = arith.constant 66 : index
    %c0_33 = arith.constant 0 : index
    %146 = vector.load %arg1[%c66, %c0_33] : memref<184x128xf32, #tpu.memory_space<vmem>>, vector<1x64xf32>
    %147 = arith.addf %145, %146 : vector<1x64xf32>
    %148 = math.tanh %147 : vector<1x64xf32>
    %c0_34 = arith.constant 0 : index
    %c0_35 = arith.constant 0 : index
    %149 = vector.load %arg1[%c0_34, %c0_35] : memref<184x128xf32, #tpu.memory_space<vmem>>, vector<64x64xf32>
    %cst_36 = arith.constant dense<0.000000e+00> : vector<1x64xf32>
    %150 = tpu.matmul %148, %149, %cst_36 {dimension_numbers = #tpu.dot_dimension_numbers<[1], [0], [0], [1], [0, 0, 1, 1], [], []>} : vector<1x64xf32>, vector<64x64xf32>, vector<1x64xf32> -> vector<1x64xf32>
    %c67 = arith.constant 67 : index
    %c0_37 = arith.constant 0 : index
    %151 = vector.load %arg1[%c67, %c0_37] : memref<184x128xf32, #tpu.memory_space<vmem>>, vector<1x64xf32>
    %152 = arith.addf %150, %151 : vector<1x64xf32>
    %153 = math.tanh %152 : vector<1x64xf32>
    %c68 = arith.constant 68 : index
    %c0_38 = arith.constant 0 : index
    %154 = vector.load %arg1[%c68, %c0_38] : memref<184x128xf32, #tpu.memory_space<vmem>>, vector<1x64xf32>
    %155 = arith.mulf %153, %154 : vector<1x64xf32>
    %cst_39 = arith.constant dense<0.000000e+00> : vector<1xf32>
    %156 = vector.multi_reduction <add>, %155, %cst_39 [1] : vector<1x64xf32> to vector<1xf32>
    %157 = vector.shape_cast %156 : vector<1xf32> to vector<1x1xf32>
    %c69 = arith.constant 69 : index
    %c0_40 = arith.constant 0 : index
    %158 = vector.load %arg1[%c69, %c0_40] : memref<184x128xf32, #tpu.memory_space<vmem>>, vector<1x1xf32>
    %159 = arith.addf %157, %158 : vector<1x1xf32>
    %cst_41 = arith.constant 3.930680e-01 : f32
    %160 = vector.broadcast %cst_41 : f32 to vector<1x1xf32>
    %161 = arith.addf %159, %160 : vector<1x1xf32>
    %162 = arith.mulf %77, %161 : vector<1x1xf32>
    %163 = arith.mulf %78, %161 : vector<1x1xf32>
    %cst_42 = arith.constant 4.882800e-02 : f32
    %164 = vector.broadcast %cst_42 : f32 to vector<1x1xf32>
    %165 = arith.mulf %164, %161 : vector<1x1xf32>
    %166 = arith.mulf %79, %161 : vector<1x1xf32>
    %167 = arith.mulf %80, %161 : vector<1x1xf32>
    %cst_43 = arith.constant 9.765600e-03 : f32
    %168 = vector.broadcast %cst_43 : f32 to vector<1x1xf32>
    %169 = arith.mulf %168, %161 : vector<1x1xf32>
    %c150 = arith.constant 150 : index
    %c0_44 = arith.constant 0 : index
    %170 = vector.load %arg1[%c150, %c0_44] : memref<184x128xf32, #tpu.memory_space<vmem>>, vector<9x10xf32>
    %c159 = arith.constant 159 : index
    %c0_45 = arith.constant 0 : index
    %171 = vector.load %arg1[%c159, %c0_45] : memref<184x128xf32, #tpu.memory_space<vmem>>, vector<9x1xf32>
    %c168 = arith.constant 168 : index
    %c0_46 = arith.constant 0 : index
    %172 = vector.load %arg1[%c168, %c0_46] : memref<184x128xf32, #tpu.memory_space<vmem>>, vector<9x1xf32>
    %c177 = arith.constant 177 : index
    %c0_47 = arith.constant 0 : index
    %173 = vector.load %arg1[%c177, %c0_47] : memref<184x128xf32, #tpu.memory_space<vmem>>, vector<1x10xf32>
    %174 = vector.broadcast %4 : f32 to vector<9x1xf32>
    %175 = arith.maximumf %171, %174 : vector<9x1xf32>
    %176 = arith.minimumf %172, %175 : vector<9x1xf32>
    %177 = arith.subf %176, %171 : vector<9x1xf32>
    %178 = vector.broadcast %177 : vector<9x1xf32> to vector<9x10xf32>
    %179 = arith.mulf %170, %178 : vector<9x10xf32>
    %cst_48 = arith.constant dense<0.000000e+00> : vector<10xf32>
    %180 = vector.multi_reduction <add>, %179, %cst_48 [0] : vector<9x10xf32> to vector<10xf32>
    %181 = vector.shape_cast %180 : vector<10xf32> to vector<1x10xf32>
    %182 = arith.addf %173, %181 : vector<1x10xf32>
    %c178 = arith.constant 178 : index
    %c0_49 = arith.constant 0 : index
    %183 = vector.load %arg1[%c178, %c0_49] : memref<184x128xf32, #tpu.memory_space<vmem>>, vector<1x9xf32>
    %c179 = arith.constant 179 : index
    %c0_50 = arith.constant 0 : index
    %184 = vector.load %arg1[%c179, %c0_50] : memref<184x128xf32, #tpu.memory_space<vmem>>, vector<1x9xf32>
    %185 = vector.extract_strided_slice %182 {offsets = [0, 1], sizes = [1, 9], strides = [1, 1]} : vector<1x10xf32> to vector<1x9xf32>
    %186 = vector.extract_strided_slice %182 {offsets = [0, 0], sizes = [1, 9], strides = [1, 1]} : vector<1x10xf32> to vector<1x9xf32>
    %187 = arith.subf %185, %186 : vector<1x9xf32>
    %c180 = arith.constant 180 : index
    %c0_51 = arith.constant 0 : index
    %188 = vector.load %arg1[%c180, %c0_51] : memref<184x128xf32, #tpu.memory_space<vmem>>, vector<1x9xf32>
    %189 = arith.mulf %187, %188 : vector<1x9xf32>
    %190 = vector.extract_strided_slice %182 {offsets = [0, 0], sizes = [1, 1], strides = [1, 1]} : vector<1x10xf32> to vector<1x1xf32>
    %191 = vector.broadcast %5 : f32 to vector<1x9xf32>
    %192 = arith.maximumf %183, %191 : vector<1x9xf32>
    %193 = arith.minimumf %184, %192 : vector<1x9xf32>
    %194 = arith.subf %193, %183 : vector<1x9xf32>
    %195 = arith.mulf %189, %194 : vector<1x9xf32>
    %cst_52 = arith.constant dense<0.000000e+00> : vector<1xf32>
    %196 = vector.multi_reduction <add>, %195, %cst_52 [1] : vector<1x9xf32> to vector<1xf32>
    %197 = vector.shape_cast %196 : vector<1xf32> to vector<1x1xf32>
    %198 = arith.addf %190, %197 : vector<1x1xf32>
    %199 = arith.maximumf %198, %81 : vector<1x1xf32>
    %cst_53 = arith.constant 0.000000e+00 : f32
    %200 = arith.subf %cst_53, %15 : f32
    %201 = arith.maximumf %15, %200 : f32
    %cst_54 = arith.constant 0.000000e+00 : f32
    %202 = arith.subf %cst_54, %17 : f32
    %203 = arith.maximumf %17, %202 : f32
    %cst_55 = arith.constant 3.906300e-01 : f32
    %204 = arith.cmpf olt, %201, %cst_55 : f32
    %cst_56 = arith.constant 5.000000e-01 : f32
    %205 = arith.mulf %15, %cst_56 : f32
    %cst_57 = arith.constant 0.000000e+00 : f32
    %206 = arith.select %204, %cst_57, %205 : f32
    %cst_58 = arith.constant 5.937500e-01 : f32
    %207 = arith.cmpf olt, %203, %cst_58 : f32
    %cst_59 = arith.constant 5.000000e-01 : f32
    %208 = arith.mulf %17, %cst_59 : f32
    %cst_60 = arith.constant 0.000000e+00 : f32
    %209 = arith.select %207, %cst_60, %208 : f32
    %cst_61 = arith.constant 5.000000e-01 : f32
    %210 = arith.mulf %206, %cst_61 : f32
    %211 = vector.broadcast %210 : f32 to vector<1x1xf32>
    %212 = arith.mulf %163, %211 : vector<1x1xf32>
    %213 = vector.broadcast %15 : f32 to vector<1x1xf32>
    %214 = arith.mulf %162, %213 : vector<1x1xf32>
    %215 = arith.addf %212, %214 : vector<1x1xf32>
    %cst_62 = arith.constant 5.000000e-01 : f32
    %216 = arith.mulf %209, %cst_62 : f32
    %217 = vector.broadcast %216 : f32 to vector<1x1xf32>
    %218 = arith.mulf %167, %217 : vector<1x1xf32>
    %219 = vector.broadcast %17 : f32 to vector<1x1xf32>
    %220 = arith.mulf %166, %219 : vector<1x1xf32>
    %221 = arith.addf %218, %220 : vector<1x1xf32>
    %222 = arith.cmpf ole, %215, %221 : vector<1x1xf32>
    %223 = arith.select %222, %215, %221 : vector<1x1xi1>, vector<1x1xf32>
    %cst_63 = arith.constant 8.500000e+01 : f32
    %224 = vector.broadcast %cst_63 : f32 to vector<1x1xf32>
    %225 = arith.mulf %223, %224 : vector<1x1xf32>
    %cst_64 = arith.constant 1.000000e+02 : f32
    %226 = arith.addf %0, %cst_64 : f32
    %227 = vector.broadcast %226 : f32 to vector<1x1xf32>
    %228 = arith.cmpf ogt, %227, %199 : vector<1x1xf32>
    %cst_65 = arith.constant 0.000000e+00 : f32
    %229 = arith.cmpf ogt, %13, %cst_65 : f32
    %cst_66 = arith.constant 0.000000e+00 : f32
    %230 = arith.cmpf ogt, %12, %cst_66 : f32
    %231 = arith.andi %229, %230 : i1
    %c102 = arith.constant 102 : index
    %c0_67 = arith.constant 0 : index
    %232 = vector.load %arg1[%c102, %c0_67] : memref<184x128xf32, #tpu.memory_space<vmem>>, vector<1x3xf32>
    %c103 = arith.constant 103 : index
    %c0_68 = arith.constant 0 : index
    %233 = vector.load %arg1[%c103, %c0_68] : memref<184x128xf32, #tpu.memory_space<vmem>>, vector<1x3xf32>
    %c104 = arith.constant 104 : index
    %c0_69 = arith.constant 0 : index
    %234 = vector.load %arg1[%c104, %c0_69] : memref<184x128xf32, #tpu.memory_space<vmem>>, vector<1x3xf32>
    %c105 = arith.constant 105 : index
    %c0_70 = arith.constant 0 : index
    %235 = vector.load %arg1[%c105, %c0_70] : memref<184x128xf32, #tpu.memory_space<vmem>>, vector<1x1xf32>
    %236 = vector.broadcast %11 : f32 to vector<1x3xf32>
    %237 = arith.maximumf %232, %236 : vector<1x3xf32>
    %238 = arith.minimumf %233, %237 : vector<1x3xf32>
    %239 = arith.subf %238, %232 : vector<1x3xf32>
    %240 = arith.mulf %234, %239 : vector<1x3xf32>
    %cst_71 = arith.constant dense<0.000000e+00> : vector<1xf32>
    %241 = vector.multi_reduction <add>, %240, %cst_71 [1] : vector<1x3xf32> to vector<1xf32>
    %242 = vector.shape_cast %241 : vector<1xf32> to vector<1x1xf32>
    %243 = arith.addf %235, %242 : vector<1x1xf32>
    %cst_72 = arith.constant 1.000000e+00 : f32
    %244 = vector.broadcast %cst_72 : f32 to vector<1x1xf32>
    %245 = arith.maximumf %243, %244 : vector<1x1xf32>
    %cst_73 = arith.constant 2.000000e+02 : f32
    %246 = vector.broadcast %cst_73 : f32 to vector<1x1xf32>
    %247 = arith.select %231, %245, %246 : vector<1x1xf32>
    %cst_74 = arith.constant 7.800000e+01 : f32
    %248 = vector.broadcast %cst_74 : f32 to vector<1x1xf32>
    %249 = arith.mulf %161, %248 : vector<1x1xf32>
    %cst_75 = arith.constant 2.000000e+02 : f32
    %250 = vector.broadcast %cst_75 : f32 to vector<1x1xf32>
    %251 = arith.minimumf %250, %249 : vector<1x1xf32>
    %cst_76 = arith.constant 5.000000e+02 : f32
    %252 = vector.broadcast %cst_76 : f32 to vector<1x1xf32>
    %253 = arith.minimumf %252, %247 : vector<1x1xf32>
    %254 = arith.minimumf %251, %253 : vector<1x1xf32>
    %cst_77 = arith.constant 8.500000e+03 : f32
    %255 = vector.broadcast %cst_77 : f32 to vector<1x1xf32>
    %256 = arith.select %228, %254, %255 : vector<1x1xi1>, vector<1x1xf32>
    %cst_78 = arith.constant -2.000000e+02 : f32
    %cst_79 = arith.constant -8.500000e+03 : f32
    %257 = vector.broadcast %cst_78 : f32 to vector<1x1xf32>
    %258 = vector.broadcast %cst_79 : f32 to vector<1x1xf32>
    %259 = arith.select %228, %257, %258 : vector<1x1xi1>, vector<1x1xf32>
    %260 = arith.maximumf %259, %225 : vector<1x1xf32>
    %261 = arith.minimumf %256, %260 : vector<1x1xf32>
    %262 = vector.broadcast %0 : f32 to vector<1x1xf32>
    %263 = arith.addf %262, %261 : vector<1x1xf32>
    %cst_80 = arith.constant 1.200000e+02 : f32
    %264 = vector.broadcast %cst_80 : f32 to vector<1x1xf32>
    %265 = arith.subf %199, %264 : vector<1x1xf32>
    %266 = arith.cmpf olt, %263, %265 : vector<1x1xf32>
    %cst_81 = arith.constant 8.000000e+02 : f32
    %267 = vector.broadcast %cst_81 : f32 to vector<1x1xf32>
    %268 = arith.select %266, %267, %199 : vector<1x1xi1>, vector<1x1xf32>
    %cst_82 = arith.constant 8.000000e+03 : f32
    %269 = arith.maximumf %268, %263 : vector<1x1xf32>
    %270 = vector.broadcast %cst_82 : f32 to vector<1x1xf32>
    %271 = arith.minimumf %270, %269 : vector<1x1xf32>
    %272 = vector.broadcast %0 : f32 to vector<1x1xf32>
    %273 = arith.subf %271, %272 : vector<1x1xf32>
    %cst_83 = arith.constant 8.000000e+02 : f32
    %274 = vector.broadcast %cst_83 : f32 to vector<1x1xf32>
    %275 = arith.cmpf oge, %273, %274 : vector<1x1xf32>
    %276 = vector.broadcast %0 : f32 to vector<1x1xf32>
    %277 = arith.select %275, %276, %271 : vector<1x1xi1>, vector<1x1xf32>
    %278 = tpu.iota {dimensions = array<i32: 1>} : vector<1x128xi32>
    %c0_i32_84 = arith.constant 0 : i32
    %279 = vector.broadcast %c0_i32_84 : i32 to vector<1x128xi32>
    %280 = arith.cmpi eq, %278, %279 : vector<1x128xi32>
    %cst_85 = arith.constant 0.000000e+00 : f32
    %281 = vector.shape_cast %277 : vector<1x1xf32> to vector<1x1xf32>
    %282 = vector.broadcast %281 : vector<1x1xf32> to vector<1x128xf32>
    %283 = vector.broadcast %cst_85 : f32 to vector<1x128xf32>
    %284 = arith.select %280, %282, %283 : vector<1x128xi1>, vector<1x128xf32>
    %c1_i32_86 = arith.constant 1 : i32
    %285 = vector.broadcast %c1_i32_86 : i32 to vector<1x128xi32>
    %286 = arith.cmpi eq, %278, %285 : vector<1x128xi32>
    %cst_87 = arith.constant 0.000000e+00 : f32
    %287 = vector.shape_cast %162 : vector<1x1xf32> to vector<1x1xf32>
    %288 = vector.broadcast %287 : vector<1x1xf32> to vector<1x128xf32>
    %289 = vector.broadcast %cst_87 : f32 to vector<1x128xf32>
    %290 = arith.select %286, %288, %289 : vector<1x128xi1>, vector<1x128xf32>
    %c2_i32_88 = arith.constant 2 : i32
    %291 = vector.broadcast %c2_i32_88 : i32 to vector<1x128xi32>
    %292 = arith.cmpi eq, %278, %291 : vector<1x128xi32>
    %cst_89 = arith.constant 0.000000e+00 : f32
    %293 = vector.shape_cast %163 : vector<1x1xf32> to vector<1x1xf32>
    %294 = vector.broadcast %293 : vector<1x1xf32> to vector<1x128xf32>
    %295 = vector.broadcast %cst_89 : f32 to vector<1x128xf32>
    %296 = arith.select %292, %294, %295 : vector<1x128xi1>, vector<1x128xf32>
    %c3_i32_90 = arith.constant 3 : i32
    %297 = vector.broadcast %c3_i32_90 : i32 to vector<1x128xi32>
    %298 = arith.cmpi eq, %278, %297 : vector<1x128xi32>
    %cst_91 = arith.constant 0.000000e+00 : f32
    %299 = vector.shape_cast %165 : vector<1x1xf32> to vector<1x1xf32>
    %300 = vector.broadcast %299 : vector<1x1xf32> to vector<1x128xf32>
    %301 = vector.broadcast %cst_91 : f32 to vector<1x128xf32>
    %302 = arith.select %298, %300, %301 : vector<1x128xi1>, vector<1x128xf32>
    %c4_i32_92 = arith.constant 4 : i32
    %303 = vector.broadcast %c4_i32_92 : i32 to vector<1x128xi32>
    %304 = arith.cmpi eq, %278, %303 : vector<1x128xi32>
    %cst_93 = arith.constant 0.000000e+00 : f32
    %305 = vector.shape_cast %212 : vector<1x1xf32> to vector<1x1xf32>
    %306 = vector.broadcast %305 : vector<1x1xf32> to vector<1x128xf32>
    %307 = vector.broadcast %cst_93 : f32 to vector<1x128xf32>
    %308 = arith.select %304, %306, %307 : vector<1x128xi1>, vector<1x128xf32>
    %c5_i32_94 = arith.constant 5 : i32
    %309 = vector.broadcast %c5_i32_94 : i32 to vector<1x128xi32>
    %310 = arith.cmpi eq, %278, %309 : vector<1x128xi32>
    %cst_95 = arith.constant 0.000000e+00 : f32
    %311 = vector.shape_cast %214 : vector<1x1xf32> to vector<1x1xf32>
    %312 = vector.broadcast %311 : vector<1x1xf32> to vector<1x128xf32>
    %313 = vector.broadcast %cst_95 : f32 to vector<1x128xf32>
    %314 = arith.select %310, %312, %313 : vector<1x128xi1>, vector<1x128xf32>
    %c6_i32_96 = arith.constant 6 : i32
    %315 = vector.broadcast %c6_i32_96 : i32 to vector<1x128xi32>
    %316 = arith.cmpi eq, %278, %315 : vector<1x128xi32>
    %cst_97 = arith.constant 0.000000e+00 : f32
    %317 = vector.shape_cast %215 : vector<1x1xf32> to vector<1x1xf32>
    %318 = vector.broadcast %317 : vector<1x1xf32> to vector<1x128xf32>
    %319 = vector.broadcast %cst_97 : f32 to vector<1x128xf32>
    %320 = arith.select %316, %318, %319 : vector<1x128xi1>, vector<1x128xf32>
    %c7_i32 = arith.constant 7 : i32
    %321 = vector.broadcast %c7_i32 : i32 to vector<1x128xi32>
    %322 = arith.cmpi eq, %278, %321 : vector<1x128xi32>
    %cst_98 = arith.constant 0.000000e+00 : f32
    %323 = vector.shape_cast %166 : vector<1x1xf32> to vector<1x1xf32>
    %324 = vector.broadcast %323 : vector<1x1xf32> to vector<1x128xf32>
    %325 = vector.broadcast %cst_98 : f32 to vector<1x128xf32>
    %326 = arith.select %322, %324, %325 : vector<1x128xi1>, vector<1x128xf32>
    %c8_i32 = arith.constant 8 : i32
    %327 = vector.broadcast %c8_i32 : i32 to vector<1x128xi32>
    %328 = arith.cmpi eq, %278, %327 : vector<1x128xi32>
    %cst_99 = arith.constant 0.000000e+00 : f32
    %329 = vector.shape_cast %167 : vector<1x1xf32> to vector<1x1xf32>
    %330 = vector.broadcast %329 : vector<1x1xf32> to vector<1x128xf32>
    %331 = vector.broadcast %cst_99 : f32 to vector<1x128xf32>
    %332 = arith.select %328, %330, %331 : vector<1x128xi1>, vector<1x128xf32>
    %c9_i32 = arith.constant 9 : i32
    %333 = vector.broadcast %c9_i32 : i32 to vector<1x128xi32>
    %334 = arith.cmpi eq, %278, %333 : vector<1x128xi32>
    %cst_100 = arith.constant 0.000000e+00 : f32
    %335 = vector.shape_cast %169 : vector<1x1xf32> to vector<1x1xf32>
    %336 = vector.broadcast %335 : vector<1x1xf32> to vector<1x128xf32>
    %337 = vector.broadcast %cst_100 : f32 to vector<1x128xf32>
    %338 = arith.select %334, %336, %337 : vector<1x128xi1>, vector<1x128xf32>
    %c10_i32 = arith.constant 10 : i32
    %339 = vector.broadcast %c10_i32 : i32 to vector<1x128xi32>
    %340 = arith.cmpi eq, %278, %339 : vector<1x128xi32>
    %cst_101 = arith.constant 0.000000e+00 : f32
    %341 = vector.shape_cast %218 : vector<1x1xf32> to vector<1x1xf32>
    %342 = vector.broadcast %341 : vector<1x1xf32> to vector<1x128xf32>
    %343 = vector.broadcast %cst_101 : f32 to vector<1x128xf32>
    %344 = arith.select %340, %342, %343 : vector<1x128xi1>, vector<1x128xf32>
    %c11_i32 = arith.constant 11 : i32
    %345 = vector.broadcast %c11_i32 : i32 to vector<1x128xi32>
    %346 = arith.cmpi eq, %278, %345 : vector<1x128xi32>
    %cst_102 = arith.constant 0.000000e+00 : f32
    %347 = vector.shape_cast %220 : vector<1x1xf32> to vector<1x1xf32>
    %348 = vector.broadcast %347 : vector<1x1xf32> to vector<1x128xf32>
    %349 = vector.broadcast %cst_102 : f32 to vector<1x128xf32>
    %350 = arith.select %346, %348, %349 : vector<1x128xi1>, vector<1x128xf32>
    %c12_i32 = arith.constant 12 : i32
    %351 = vector.broadcast %c12_i32 : i32 to vector<1x128xi32>
    %352 = arith.cmpi eq, %278, %351 : vector<1x128xi32>
    %cst_103 = arith.constant 0.000000e+00 : f32
    %353 = vector.shape_cast %221 : vector<1x1xf32> to vector<1x1xf32>
    %354 = vector.broadcast %353 : vector<1x1xf32> to vector<1x128xf32>
    %355 = vector.broadcast %cst_103 : f32 to vector<1x128xf32>
    %356 = arith.select %352, %354, %355 : vector<1x128xi1>, vector<1x128xf32>
    %357 = arith.addf %284, %290 : vector<1x128xf32>
    %358 = arith.addf %296, %302 : vector<1x128xf32>
    %359 = arith.addf %308, %314 : vector<1x128xf32>
    %360 = arith.addf %320, %326 : vector<1x128xf32>
    %361 = arith.addf %332, %338 : vector<1x128xf32>
    %362 = arith.addf %344, %350 : vector<1x128xf32>
    %363 = arith.addf %357, %358 : vector<1x128xf32>
    %364 = arith.addf %359, %360 : vector<1x128xf32>
    %365 = arith.addf %361, %362 : vector<1x128xf32>
    %366 = arith.addf %363, %364 : vector<1x128xf32>
    %367 = arith.addf %365, %356 : vector<1x128xf32>
    %368 = arith.addf %366, %367 : vector<1x128xf32>
    %c0_104 = arith.constant 0 : index
    %c0_105 = arith.constant 0 : index
    %369 = vector.load %arg2[%c0_104, %c0_105] : memref<1x128xf32, #tpu.memory_space<vmem>>, vector<1x128xf32>
    tpu.vector_store %arg2[%c0_104, %c0_105], %368 {strides = array<i32>} : memref<1x128xf32, #tpu.memory_space<vmem>>, vector<1x128xf32>,
    return
  }
}

</mosaic_0001>

<bundles_post_ra>
// kernel: _forward.1
= control target key start
LH: loop header
LB: loop body
LE: loop exit
PB: predicated region body
PF: predicated region fallthrough
CT: control target
= control target key end

     0   :  { %7 = vsyncpa [#allocation5], 0  ;;  %s886_s0 = inlined_call_operand.vmem [shape: f32[18], index: 0, kind: input, shape index: {}]   ;;  %s887_s1 = inlined_call_operand.hbm [shape: f32[184,128], index: 1, kind: input, shape index: {}]   ;;  %s888_s2 = inlined_call_operand.hbm [shape: f32[1,128], index: 2, kind: output, shape index: {}]  }
   0x1   :  { %8 = vsyncpa [#allocation3], 0 }
   0x2   :  { %9 = vsyncpa [#allocation4], 0  ;;  %s16_s11 = sshll.u32 %s886_s0, 4  ;;  %s17_s11 = int_to_ptr.vmem [resolvable:$true] %s16_s11 }
   0x3   :  { %s701_s12 = scalar_lea.vmem %s17_s11, 16  ;;  %p706_p1 = scmp.lt.s32.totalorder %s17_s11, %s17_s11 }
   0x4   :  { %p702_p0 = scmp.ne.s32.totalorder %s17_s11, %s701_s12  ;;  %p707_p2 = scmp.lt.s32.totalorder %s701_s12, %s701_s12 }
   0x6   :  { %p708_p3 = por %p707_p2, %p706_p1 }
   0x8   :  { %p709_p4 = pnand %p708_p3, %p702_p0 }
   0xa   :  { %712 = shalt.err (!%p709_p4)
}
   0xb   :  { %s759_s13 = smov [#allocation2]   ;;  %s760_s14 = smov [#allocation6]  }
   0xc   :  { %19 = dma.vmem_to_smem %s17_s11, 16, %s759_s13, [#allocation5]  }
   0xd   :  { %s25_s15 = sshll.u32 %s760_s14, 4  ;;  %s26_s15 = int_to_ptr.vmem [resolvable:$true] %s25_s15 }
   0xe   :  { %s721_s16 = scalar_lea.vmem %s26_s15, 2944  ;;  %p726_p6 = scmp.lt.s32.totalorder %s26_s15, %s26_s15 }
   0xf   :  { %p722_p5 = scmp.ne.s32.totalorder %s26_s15, %s721_s16  ;;  %p727_p7 = scmp.lt.s32.totalorder %s721_s16, %s721_s16 }
  0x11   :  { %p728_p8 = por %p727_p7, %p726_p6 }
  0x13   :  { %p729_p9 = pnand %p728_p8, %p722_p5 }
  0x15   :  { %732 = shalt.err (!%p729_p9)
}
  0x16   :  { %s761_s0 = smov 128   ;;  %s762_s17 = smov 8  }
  0x17   :  { %31 = dma.hbm_to_vmem [thread:$0]  %s887_s1, 2944, %s26_s15, [#allocation3], %s761_s0, %s761_s0, %s762_s17  }
  0x18   :  { %753 = dma.done.wait [#allocation5], 16  }
  0x19   :  { %754 = vsyncadd [#allocation5], 4294967280 }
  0x1a   :  { %755 = dma.done.wait [#allocation3], 2944  }
  0x1b   :  { %756 = vsyncadd [#allocation3], 4294964352 }
  0x1c   :  { %38 = sfence }
  0x1d   :  { %s793_s20 = sld [smem:[#allocation2 + $0x1]]  ;;  %v60_v0 = vlaneseq  ;;  %v763_v1 = vmov 0   ;;  %v125_v2 = vld [vmem:[#allocation6 + $0x7e] sm:$0xff]  ;;  %v102_v3 = vld [vmem:[#allocation6 + $0x7c] sm:$0x1]  ;;  %v126_v5 = vld [vmem:[#allocation6 + $0x86] sm:$0xff] }
  0x1e   :  { %695 = vset.pattern.permute.xlu1 %v763_v1  ;;  %696 = vset.pattern.permute.xlu0 %v763_v1  ;;  %v103_v7 = vld [vmem:[#allocation6 + $0x7d] sm:$0x1]  ;;  %v100_v12 = vld [vmem:[#allocation6 + $0x6a] sm:$0xff]  ;;  %v101_v13 = vld [vmem:[#allocation6 + $0x72] sm:$0x1]  ;;  %vm115_vm0 = vcmask 105472  }
  0x1f   :  { %146 = vperm.xlu1 %695, %v125_v2   ;;  %v796_v4 = vshrl.u32 %v60_v0, 7  ;;  %vm119_vm1 = vcmask 98304   ;;  %v104_v19 = vld [vmem:[#allocation6 + $0x73] sm:$0xff]  ;;  %v105_v23 = vld [vmem:[#allocation6 + $0x7b] sm:$0x1]  ;;  %s646_s1 = sld [smem:[#allocation2 + $0x9]] }
  0x20   :  { %v132_v21 = vld [vmem:[#allocation6 + $0x8e] sm:$0xff]  ;;  %s647_s21 = sld [smem:[#allocation2 + $0xa]]  ;;  %s764_s27 = smov 10.0   ;;  %v87_v48 = vld [vmem:[#allocation6 + $0x46] sm:$0x7f]  ;;  %vm95_vm9 = vcmask 71680  }
  0x21   :  { %v111_v10 = vsub.s32 0, %v796_v4  ;;  %v134_v25 = vrot.slane %v132_v21, 7  ;;  %s800_s23 = sld [smem:[#allocation2 + $0x4]]  ;;  %vm62_vm2 = vcmp.eq.s32.totalorder %v796_v4, 0  ;;  %vm65_vm3 = vcmp.eq.s32.totalorder %v796_v4, 1  ;;  %s765_s29 = smov 20.0  }
  0x22   :  { %s802_s24 = sld [smem:[#allocation2 + $0x5]]  ;;  %vm76_vm4 = vcmp.eq.s32.totalorder %v796_v4, 4  ;;  %vm79_vm5 = vcmp.eq.s32.totalorder %v796_v4, 5  ;;  %vm82_vm6 = vcmp.eq.s32.totalorder %v796_v4, 6  ;;  %vm69_vm7 = vcmp.eq.s32.totalorder %v796_v4, 2  ;;  %s768_s10 = smov 1  }
  0x23   :  { %v63_v6 = vstv %s793_s20  ;;  %152 = vperm.xlu1 %695, %v126_v5   ;;  %s643_s25 = sld [smem:[#allocation2 + $0x6]]  ;;  %s58_s28 = smax.f32 %s764_s27, %s793_s20  ;;  %vm72_vm8 = vcmp.eq.s32.totalorder %v796_v4, 3  ;;  %v88_v50 = vld [vmem:[#allocation6 + $0x4d] sm:$0x7f]  ;;  %v89_v53 = vld [vmem:[#allocation6 + $0x54] sm:$0x7f] }
  0x24   :  { %v106_v8 = vmax.f32 %v102_v3, %v63_v6  ;;  %s644_s26 = sld [smem:[#allocation2 + $0x7]]  ;;  %s59_s30 = smin.f32 %s765_s29, %s58_s28  ;;  %v64_v34 = vsel %vm62_vm2, %v63_v6, 0.0  ;;  %v829_v57 = vand.u32 127, %v60_v0  ;;  %vm174_vm11 = vcmask 1046528   ;;  %v198_v21 = vld [vmem:[#allocation6 + $0x62] sm:$0x1] }
  0x25   :  { %v83_v35 = vstv %s59_s30  ;;  %s639_s7 = sld [smem:[#allocation2 + $0x2]]  ;;  %vm179_vm12 = vcmask 15360   ;;  %vm192_vm13 = vcmask 8192   ;;  %vm206_vm14 = vcmask 57344   ;;  %s769_s12 = smov 127  }
  0x26   :  { %v107_v9 = vmin.f32 %v103_v7, %v106_v8  ;;  %s57_s22 = ssub.f32 %s646_s1, %s647_s21  ;;  %v84_v41 = vsel %vm82_vm6, %v83_v35, 0.0  ;;  %vm140_vm10 = vcmp.eq.s32.totalorder %v829_v57, 0  ;;  %vm767_vm15 = vmmov 0  }
  0x27   :  { %s640_s8 = sld [smem:[#allocation2 + $0x3]]  ;;  %v351_v35 = vstv %s800_s23  ;;  %vm245_vm2 = vcmask 523264  }
  0x28   :  { %v108_v11 = vsub.f32 %v107_v9, %v102_v3  ;;  %v66_v32 = vstv %s57_s22  ;;  %s645_s9 = sld [smem:[#allocation2 + $0x8]] }
  0x29   :  { %s55_s3 = ssub.f32 %s800_s23, %s643_s25  ;;  %v67_v33 = vsel %vm65_vm3, %v66_v32, 0.0  ;;  %vm464_vm3 = vcmask 16384  }
  0x2a   :  { %v112_v14 = vrot.slane %v108_v11, %v111_v10  ;;  %s53_s4 = ssub.f32 %s644_s26, %s802_s24  ;;  %v68_v36 = vadd.f32 %v67_v33, %v64_v34  ;;  %v346_v34 = vld [vmem:[#allocation6 + $0x9f] sm:$0xff] }
  0x2b   :  { %s809_s5 = smul.f32 0.0996, %s55_s3  ;;  %v141_v58 = vstv %s639_s7  ;;  %s648_s11 = sld [smem:[#allocation2 + $0xf]] }
  0x2c   :  { %v113_v15 = vmul.f32 %v112_v14, %v100_v12  ;;  %v114_v16 = vmul.f32 %v112_v14, %v101_v13  ;;  %s814_s6 = smul.f32 0.0244, %s53_s4  ;;  %s852_s17 = sld [smem:[#allocation2 + $0x10]] }
  0x2d   :  { %v819_v37 = vstv %s809_s5  ;;  %v142_v59 = vstv %s640_s8  ;;  %s418_s14 = ssub.f32 0.0, %s809_s5  ;;  %s424_s18 = smul.f32 0.5, %s809_s5 }
  0x2e   :  { %v116_v17 = vsel %vm115_vm0, %v113_v15, 0.0  ;;  %v120_v18 = vsel %vm119_vm1, %v114_v16, 0.0  ;;  %v822_v38 = vstv %s814_s6  ;;  %v78_v39 = vsel %vm76_vm4, %v819_v37, 0.0  ;;  %s416_s13 = ssub.f32 0.0, %s814_s6  ;;  %s421_s0 = smul.f32 0.5, %s814_s6 }
  0x2f   :  { %117 = vadd.xlane.f32.xlu0 %v116_v17  ;;  %v80_v40 = vsel %vm79_vm5, %v819_v37, 0.0  ;;  %v71_v42 = vsel %vm69_vm7, %v822_v38, 0.0  ;;  %v73_v43 = vsel %vm72_vm8, %v822_v38, 0.0  ;;  %v143_v61 = vsel %vm140_vm10, %v141_v58, %v142_v59  ;;  %v238_v58 = vld [vmem:[#allocation6 + $0x10] sm:$0xff]  ;;  %v237_v59 = vld [vmem:[#allocation6 + $0x8] sm:$0xff]  ;;  %s419_s16 = smax.f32 %s418_s14, %s809_s5  ;;  %s855_s19 = sld [smem:[#allocation2 + $0x11]] }
  0x30   :  { %v81_v44 = vadd.f32 %v80_v40, %v78_v39  ;;  %v74_v45 = vadd.f32 %v73_v43, %v71_v42  ;;  %v201_v39 = vld [vmem:[#allocation6 + $0x65] sm:$0x1]  ;;  %v348_v40 = vld [vmem:[#allocation6 + $0xa8] sm:$0xff]  ;;  %vm370_vm0 = vcmask 80896   ;;  %vm372_vm1 = vcmask 73728   ;;  %s417_s15 = smax.f32 %s416_s13, %s814_s6  ;;  %p423_p11 = scmp.lt.f32.partialorder %s419_s16, 0.59375 }
  0x31   :  { %vm322_vm4 = vcmask 516096   ;;  %vm408_vm5 = vcmask 65536   ;;  %p420_p10 = scmp.lt.f32.partialorder %s417_s15, 0.39063  ;;  %s39_s22 = sld [smem:[#allocation2]] }
  0x32   :  { %v85_v46 = vadd.f32 %v84_v41, %v81_v44  ;;  %v75_v47 = vadd.f32 %v74_v45, %v68_v36  ;;  %v352_v36 = vmax.f32 %v346_v34, %v351_v35  ;;  %v347_v41 = vld [vmem:[#allocation6 + $0xa7] sm:$0x1]  ;;  %s892_s18 = smov (%p423_p11, %s424_s18), 0.0  ;;  %p452_p13 = scmp.gt.f32.partialorder %s852_s17, 0.0 }
  0x33   :  { %121 = vadd.xlane.f32.xlu0 %v120_v18  ;;  %v353_v45 = vmax.f32 %v347_v41, %v351_v35  ;;  %v459_v35 = vstv %s648_s11  ;;  %s890_s0 = smov (%p420_p10, %s421_s0), 0.0  ;;  %s434_s1 = smul.f32 0.5, %s892_s18 }
  0x34   :  { %v86_v49 = vadd.f32 %v85_v46, %v75_v47  ;;  %v354_v44 = vmin.f32 %v348_v40, %v352_v36  ;;  %v349_v46 = vld [vmem:[#allocation6 + $0xb0] sm:$0x1]  ;;  %s426_s20 = smul.f32 0.5, %s890_s0 }
  0x35   :  { %p451_p12 = scmp.gt.f32.partialorder %s855_s19, 0.0 }
  0x36   :  { %v91_v51 = vmax.f32 %v87_v48, %v86_v49  ;;  %v355_v49 = vmin.f32 %v349_v46, %v353_v45 }
  0x37   :  { %p453_p0 = pnand %p452_p13, %p451_p12  ;;  %s448_s23 = sadd.f32 100.0, %s39_s22 }
  0x38   :  { %v92_v52 = vmin.f32 %v88_v50, %v91_v51  ;;  %v766_v50 = vmov 0.0   ;;  %v243_v51 = vld [vmem:[#allocation6 + $0x38] sm:$0xff] }
  0x39   :  { %663 = vmatprep.subr.mxu0 %v766_v50  ;;  %679 = vmatprep.mubr.msk.f32.mxu0 %vm767_vm15, %v766_v50  ;;  %s652_s21 = scalar_select %p453_p0, 0, 1  ;;  %vm501_vm15 = vcmp.eq.s32.totalorder %v829_v57, 1 }
  0x3a   :  { %v93_v54 = vsub.f32 %v92_v52, %v87_v48  ;;  %v356_v48 = vsub.f32 %v354_v44, %v346_v34  ;;  %664 = vmatpush3.msra.mxu0 %v243_v51  ;;  %v242_v52 = vld [vmem:[#allocation6 + $0x30] sm:$0xff]  ;;  %v455_v34 = vld [vmem:[#allocation6 + $0x66] sm:$0x1]  ;;  %v244_v51 = vld [vmem:[#allocation6 + $0x43] sm:$0x1] }
  0x3b   :  { %665 = vmatprep.subr.mxu0 %v766_v50  ;;  %v460_v36 = vmax.f32 %v455_v34, %v459_v35 }
  0x3c   :  { %v94_v55 = vmul.f32 %v93_v54, %v89_v53  ;;  %666 = vmatpush3.msra.mxu0 %v242_v52  ;;  %v357_v53 = vsub.f32 %v355_v49, %v347_v41  ;;  %v241_v54 = vld [vmem:[#allocation6 + $0x28] sm:$0xff] }
  0x3d   :  { %667 = vmatprep.subr.mxu0 %v766_v50 }
  0x3e   :  { %v96_v56 = vsel %vm95_vm9, %v94_v55, 0.0  ;;  %668 = vmatpush3.msra.mxu0 %v241_v54  ;;  %v240_v55 = vld [vmem:[#allocation6 + $0x20] sm:$0xff] }
  0x3f   :  { %669 = vmatprep.subr.mxu0 %v766_v50 }
  0x40   :  { %670 = vmatpush3.msra.mxu0 %v240_v55  ;;  %v320_v55 = vld [vmem:[#allocation6 + $0x44] sm:$0x1] }
  0x41   :  { %671 = vmatprep.subr.mxu0 %v766_v50 }
  0x9a   :  { %v147_v60 = vpop.permute.xlu1 %146 }
  0x9b   :  { %v149_v62 = vmax.f32 %v147_v60, %v143_v61  ;;  %v389_v61 = vld [vmem:[#allocation6 + $0xb4] sm:$0x1] }
  0x9e   :  { %v153_v63 = vpop.permute.xlu1 %152 }
  0x9f   :  { %v155_v1 = vmin.f32 %v153_v63, %v149_v62  ;;  %v382_v62 = vld [vmem:[#allocation6 + $0xb2] sm:$0x1]  ;;  %v395_v63 = vstv %s802_s24  ;;  %s771_s24 = smov [#allocation7]  }
  0xa0   :  { %s628_s25 = sshll.u32 %s771_s24, 4  ;;  %s629_s25 = int_to_ptr.vmem [resolvable:$true] %s628_s25 }
  0xa1   :  { %v156_v2 = vsub.f32 %v155_v1, %v147_v60  ;;  %v236_v60 = vld [vmem:[#allocation6] sm:$0xff]  ;;  %v396_v1 = vmax.f32 %v382_v62, %v395_v63  ;;  %s733_s26 = scalar_lea.vmem %s629_s25, 16  ;;  %s737_s27 = scalar_lea.vmem %s629_s25, 32 }
  0xa2   :  { %p734_p1 = scmp.ne.s32.totalorder %s629_s25, %s733_s26  ;;  %p738_p2 = scmp.lt.s32.totalorder %s629_s25, %s629_s25 }
  0xa3   :  { %v168_v3 = vrot.slane %v156_v2, 7  ;;  %v383_v2 = vld [vmem:[#allocation6 + $0xb3] sm:$0x1]  ;;  %p739_p3 = scmp.lt.s32.totalorder %s737_s27, %s733_s26 }
  0xa5   :  { %p740_p4 = por %p739_p3, %p738_p2 }
  0xa7   :  { %p741_p5 = pnand %p740_p4, %p734_p1 }
  0xb8   :  { %v118_v20 = vpop.xlane.xlu0 %117 }
  0xb9   :  { %v123_v22 = vadd.f32 %v118_v20, %v104_v19  ;;  %v196_v20 = vstv %s645_s9 }
  0xbb   :  { %v128_v24 = vrot.slane %v123_v22, 7 }
  0xbc   :  { %v122_v26 = vpop.xlane.xlu0 %121 }
  0xbd   :  { %v124_v27 = vadd.f32 %v122_v26, %v105_v23  ;;  %v130_v28 = vsub.f32 %v123_v22, %v128_v24 }
  0xbf   :  { %v131_v29 = vsub.f32 %v124_v27, %v128_v24  ;;  %v136_v30 = vmul.f32 %v134_v25, %v130_v28  ;;  %v199_v24 = vld [vmem:[#allocation6 + $0x63] sm:$0x1]  ;;  %v200_v27 = vld [vmem:[#allocation6 + $0x64] sm:$0x1] }
  0xc1   :  { %159 = vperm.xlu0 %696, %v136_v30   ;;  %v137_v31 = vmul.f32 %v134_v25, %v131_v29 }
  0xc3   :  { %164 = vperm.xlu1 %695, %v137_v31   ;;  %v90_v31 = vld [vmem:[#allocation6 + $0x5b] sm:$0x7f] }
  0xc7   :  { %188 = vperm.xlu1 %695, %v123_v22  }
  0xe0   :  { %97 = vadd.xlane.f32.xlu0 %v96_v56  ;;  %v239_v56 = vld [vmem:[#allocation6 + $0x18] sm:$0xff] }
  0xe1   :  { %672 = vmatpush3.msra.mxu0 %v239_v56 }
  0xe2   :  { %673 = vmatprep.subr.mxu0 %v766_v50 }
  0xe3   :  { %674 = vmatpush3.msra.mxu0 %v238_v58 }
  0xe4   :  { %675 = vmatprep.subr.mxu0 %v766_v50 }
  0xe5   :  { %676 = vmatpush3.msra.mxu0 %v237_v59 }
  0xe6   :  { %677 = vmatprep.subr.mxu0 %v766_v50 }
  0xe7   :  { %678 = vmatpush3.msra.mxu0 %v236_v60 }
 0x13c   :  { %v160_v4 = vpop.permute.xlu0 %159 }
 0x13d   :  { %v170_v5 = vmul.f32 %v168_v3, %v160_v4 }
 0x13e   :  { %v165_v6 = vpop.permute.xlu1 %164 }
 0x13f   :  { %v171_v7 = vmul.f32 %v168_v3, %v165_v6  ;;  %v175_v0 = vrot.slane %v170_v5, 1  ;;  %v397_v3 = vmin.f32 %v383_v2, %v396_v1  ;;  %v219_v5 = vld [vmem:[#allocation6 + $0x41] sm:$0x1] }
 0x140   :  { %v226_v6 = vrot.slane %v219_v5, 7 }
 0x141   :  { %v176_v8 = vrot.slane %v171_v7, 1  ;;  %v398_v4 = vsub.f32 %v397_v3, %v382_v62  ;;  %v326_v62 = vld [vmem:[#allocation6 + $0x45] sm:$0x1] }
 0x142   :  { %v189_v17 = vpop.permute.xlu1 %188 }
 0x143   :  { %v177_v9 = vsel %vm174_vm11, %v175_v0, %v176_v8  ;;  %v212_v8 = vld [vmem:[#allocation6 + $0x40] sm:$0x1] }
 0x144   :  { %v180_v10 = vsel %vm179_vm12, %v177_v9, 0.0  ;;  %vm515_vm12 = vcmp.eq.s32.totalorder %v829_v57, 3 }
 0x145   :  { %v181_v11 = vrot.slane %v180_v10, 4 }
 0x147   :  { %v182_v12 = vadd.f32 %v181_v11, %v180_v10 }
 0x149   :  { %v183_v13 = vrot.slane %v182_v12, 2 }
 0x14b   :  { %v184_v14 = vadd.f32 %v183_v13, %v182_v12  ;;  %v233_v12 = vld [vmem:[#allocation6 + $0x42] sm:$0x1] }
 0x14d   :  { %v185_v15 = vrot.slane %v184_v14, 1 }
 0x14f   :  { %v186_v16 = vadd.f32 %v185_v15, %v184_v14  ;;  %v344_v14 = vld [vmem:[#allocation6 + $0x96] sm:$0xff] }
 0x151   :  { %v191_v18 = vadd.f32 %v189_v17, %v186_v16  ;;  %v345_v17 = vld [vmem:[#allocation6 + $0x9e] sm:$0x1] }
 0x153   :  { %v193_v19 = vsel %vm192_vm13, %v191_v18, inf  ;;  %vm529_vm13 = vcmp.eq.s32.totalorder %v829_v57, 5 }
 0x154   :  { %194 = vmin.xlane.f32.xlu1 %v193_v19 }
 0x169   :  { %v98_v32 = vpop.xlane.xlu0 %97 }
 0x16a   :  { %v834_v33 = vadd.f32 %v98_v32, %v90_v31 }
 0x1dd   :  { %v195_v22 = vpop.xlane.xlu1 %194 }
 0x1de   :  { %v197_v23 = vsub.f32 %v195_v22, %v196_v20 }
 0x1e0   :  { %v202_v25 = vmax.f32 %v198_v21, %v197_v23 }
 0x1e2   :  { %v203_v26 = vmin.f32 %v199_v24, %v202_v25 }
 0x1e4   :  { %v204_v28 = vsub.f32 %v203_v26, %v198_v21 }
 0x1e6   :  { %v205_v29 = vmul.f32 %v204_v28, %v200_v27 }
 0x1e8   :  { %v207_v30 = vsel %vm206_vm14, %v205_v29, 0.0  ;;  %vm508_vm14 = vcmp.eq.s32.totalorder %v829_v57, 2 }
 0x1e9   :  { %208 = vadd.xlane.f32.xlu1 %v207_v30  ;;  %v350_v30 = vld [vmem:[#allocation6 + $0xb1] sm:$0x1] }
 0x1fa   :  { %222 = vperm.xlu1 %695, %v834_v33  }
 0x272   :  { %v209_v42 = vpop.xlane.xlu1 %208 }
 0x273   :  { %v210_v43 = vadd.f32 %v209_v42, %v201_v39  ;;  %v456_v39 = vld [vmem:[#allocation6 + $0x67] sm:$0x1]  ;;  %v457_v42 = vld [vmem:[#allocation6 + $0x68] sm:$0x1] }
 0x274   :  { %v461_v40 = vmin.f32 %v456_v39, %v460_v36  ;;  %v449_v39 = vstv %s448_s23 }
 0x275   :  { %v211_v47 = vmin.f32 %v834_v33, %v210_v43 }
 0x276   :  { %v223_v7 = vpop.permute.xlu1 %222  ;;  %v462_v41 = vsub.f32 %v461_v40, %v455_v34 }
 0x277   :  { %215 = vperm.xlu1 %695, %v211_v47   ;;  %v228_v0 = vmul.f32 %v226_v6, %v223_v7 }
 0x278   :  { %v463_v43 = vmul.f32 %v462_v41, %v457_v42 }
 0x279   :  { %v230_v10 = vrot.slane %v228_v0, 1 }
 0x27a   :  { %v465_v44 = vsel %vm464_vm3, %v463_v43, 0.0  ;;  %v770_v43 = vmov -8500.0   ;;  %vm535_vm3 = vcmp.eq.s32.totalorder %v829_v57, 6 }
 0x27b   :  { %360 = vperm.xlu1 %695, %v356_v48  }
 0x27f   :  { %365 = vperm.xlu1 %695, %v357_v53  }
 0x283   :  { %391 = vrot.lane.b32.xlu1 %v389_v61, %s768_s10 }
 0x287   :  { %400 = vrot.lane.b32.xlu1 %v398_v4, %s768_s10 }
 0x2f2   :  { %v216_v9 = vpop.permute.xlu1 %215 }
 0x2f3   :  { %v218_v11 = vmul.f32 %v216_v9, %v212_v8 }
 0x2f5   :  { %v232_v13 = vadd.f32 %v230_v10, %v218_v11 }
 0x2f6   :  { %v361_v15 = vpop.permute.xlu1 %360 }
 0x2f7   :  { %v234_v16 = vadd.f32 %v233_v12, %v232_v13  ;;  %v368_v18 = vmul.f32 %v361_v15, %v344_v14  ;;  %v427_v13 = vstv %s426_s20 }
 0x2f9   :  { %697 = vtanh.f32 %v234_v16  ;;  %v371_v21 = vsel %vm370_vm0, %v368_v18, 0.0  ;;  %v435_v16 = vstv %s434_s1  ;;  %vm542_vm0 = vcmp.eq.s32.totalorder %v829_v57, 7 }
 0x2fa   :  { %v366_v19 = vpop.permute.xlu1 %365 }
 0x2fb   :  { %v369_v20 = vmul.f32 %v366_v19, %v345_v17 }
 0x2fd   :  { %v373_v22 = vsel %vm372_vm1, %v369_v20, 0.0  ;;  %vm522_vm1 = vcmp.eq.s32.totalorder %v829_v57, 4 }
 0x2fe   :  { %v374_v23 = vadd.f32 %v373_v22, %v371_v21  ;;  %v392_v45 = vpop.permute.xlu1 %391  ;;  %v458_v21 = vld [vmem:[#allocation6 + $0x69] sm:$0x1] }
 0x300   :  { %v375_v24 = vrot.slane %v374_v23, 4 }
 0x302   :  { %v376_v25 = vadd.f32 %v375_v24, %v374_v23  ;;  %v401_v48 = vpop.permute.xlu1 %400  ;;  %v471_v24 = vstv %s652_s21 }
 0x303   :  { %vm472_vm7 = vcmp.eq.s32.totalorder %v471_v24, 1 }
 0x304   :  { %v377_v26 = vrot.slane %v376_v25, 2 }
 0x306   :  { %v698_v27 = vpop.eup %697  ;;  %v378_v28 = vadd.f32 %v377_v26, %v376_v25 }
 0x307   :  { %680 = vmatmul.mubr.msk.f32.vlgmr.msra.gmra.mxu0 %vm245_vm2, %v698_v27  ;;  %vm556_vm2 = vcmp.eq.s32.totalorder %v829_v57, 9 }
 0x308   :  { %v379_v29 = vrot.slane %v378_v28, 1 }
 0x30a   :  { %v380_v31 = vadd.f32 %v379_v29, %v378_v28 }
 0x30c   :  { %v842_v32 = vadd.f32 %v380_v31, %v350_v30  ;;  %v413_v31 = vrot.slane %v834_v33, 6 }
 0x30e   :  { %385 = vrot.lane.b32.xlu0 %v842_v32, %s768_s10 }
 0x32d   :  { %466 = vadd.xlane.f32.xlu0 %v465_v44 }
 0x380   :  { %v386_v46 = vpop.permute.xlu0 %385 }
 0x381   :  { %v388_v47 = vsub.f32 %v842_v32, %v386_v46 }
 0x383   :  { %v394_v49 = vmul.f32 %v392_v45, %v388_v47  ;;  %v485_v47 = vstv %s39_s22 }
 0x385   :  { %v403_v50 = vmul.f32 %v401_v48, %v394_v49 }
 0x387   :  { %405 = vrot.lane.b32.xlu1 %v403_v50, %s769_s12 }
 0x3b6   :  { %v467_v22 = vpop.xlane.xlu0 %466 }
 0x3c7   :  { %v315_v52 = vpop.f32.mrf.mxu0 }
 0x3c8   :  { %v316_v53 = vadd.f32 %v315_v52, %v244_v51 }
 0x3c9   :  { %v681_v54 = vpop.f32.mrf.mxu0 }
 0x3ca   :  { %699 = vtanh.f32 %v316_v53 }
 0x3d7   :  { %v700_v56 = vpop.eup %699 }
 0x3d8   :  { %v321_v58 = vmul.f32 %v700_v56, %v320_v55 }
 0x3da   :  { %v323_v59 = vsel %vm322_vm4, %v321_v58, 0.0  ;;  %vm570_vm4 = vcmp.eq.s32.totalorder %v829_v57, 11 }
 0x3db   :  { %324 = vadd.xlane.f32.xlu1 %v323_v59 }
 0x3f9   :  { %v406_v60 = vpop.permute.xlu1 %405 }
 0x3fa   :  { %v409_v61 = vsel %vm408_vm5, %v406_v60, 0.0  ;;  %vm549_vm5 = vcmp.eq.s32.totalorder %v829_v57, 8 }
 0x3fb   :  { %410 = vadd.xlane.f32.xlu1 %v409_v61 }
 0x464   :  { %v325_v63 = vpop.xlane.xlu1 %324 }
 0x465   :  { %v327_v1 = vadd.f32 %v326_v62, %v325_v63 }
 0x467   :  { %v328_v2 = vadd.f32 0.393068, %v327_v1 }
 0x469   :  { %v343_v3 = vmul.f32 0.0097656, %v328_v2  ;;  %v336_v4 = vmul.f32 0.048828, %v328_v2  ;;  %v333_v5 = vrot.slane %v328_v2, 5  ;;  %v330_v6 = vrot.slane %v328_v2, 6 }
 0x46a   :  { %v337_v7 = vrot.slane %v328_v2, 4  ;;  %v340_v10 = vrot.slane %v328_v2, 3  ;;  %v474_v26 = vmul.f32 78.0, %v328_v2 }
 0x46b   :  { %559 = vperm.xlu0 %696, %v343_v3   ;;  %518 = vperm.xlu1 %695, %v336_v4   ;;  %v332_v0 = vmul.f32 %v330_v6, %v834_v33  ;;  %v335_v9 = vmul.f32 %v333_v5, %v834_v33 }
 0x46c   :  { %v339_v8 = vmul.f32 %v337_v7, %v834_v33  ;;  %v342_v14 = vmul.f32 %v340_v10, %v834_v33  ;;  %v475_v35 = vmin.f32 %v474_v26, 200.0 }
 0x46d   :  { %v429_v11 = vmul.f32 %v332_v0, %v822_v38  ;;  %v428_v17 = vmul.f32 %v427_v13, %v335_v9 }
 0x46e   :  { %v437_v12 = vmul.f32 %v339_v8, %v819_v37  ;;  %v436_v20 = vmul.f32 %v435_v16, %v342_v14  ;;  %v468_v37 = vadd.f32 %v467_v22, %v458_v21 }
 0x46f   :  { %511 = vperm.xlu0 %696, %v335_v9   ;;  %504 = vperm.xlu1 %695, %v332_v0   ;;  %v431_v15 = vrot.slane %v429_v11, 7 }
 0x470   :  { %v439_v18 = vrot.slane %v437_v12, 7  ;;  %v469_v25 = vmax.f32 %v468_v37, 1.0 }
 0x471   :  { %v433_v19 = vadd.f32 %v431_v15, %v428_v17 }
 0x472   :  { %v441_v38 = vadd.f32 %v439_v18, %v436_v20  ;;  %v473_v28 = vsel %vm472_vm7, %v469_v25, 200.0  ;;  %vm576_vm7 = vcmp.eq.s32.totalorder %v829_v57, 12 }
 0x473   :  { %545 = vperm.xlu1 %695, %v339_v8   ;;  %531 = vperm.xlu0 %696, %v429_v11   ;;  %v476_v36 = vmin.f32 %v473_v28, 500.0 }
 0x474   :  { %v443_v23 = vrot.slane %v441_v38, 2 }
 0x475   :  { %v477_v42 = vmin.f32 %v475_v35, %v476_v36 }
 0x476   :  { %vm445_vm6 = vcmp.le.f32.partialorder %v433_v19, %v443_v23 }
 0x477   :  { %552 = vperm.xlu1 %695, %v342_v14   ;;  %538 = vperm.xlu0 %696, %v433_v19   ;;  %v446_v27 = vsel %vm445_vm6, %v433_v19, %v443_v23  ;;  %vm563_vm6 = vcmp.eq.s32.totalorder %v829_v57, 10 }
 0x478   :  { %v447_v30 = vmul.f32 85.0, %v446_v27 }
 0x47a   :  { %v481_v41 = vrot.slane %v447_v30, 3 }
 0x47b   :  { %572 = vperm.xlu1 %695, %v437_v12  }
 0x47f   :  { %525 = vperm.xlu1 %695, %v428_v17  }
 0x483   :  { %578 = vperm.xlu1 %695, %v441_v38  }
 0x484   :  { %v411_v29 = vpop.xlane.xlu1 %410 }
 0x485   :  { %v412_v34 = vadd.f32 %v411_v29, %v842_v32 }
 0x487   :  { %v415_v40 = vmax.f32 %v412_v34, %v413_v31 }
 0x489   :  { %vm450_vm8 = vcmp.gt.f32.partialorder %v449_v39, %v415_v40  ;;  %v653_v49 = vadd.f32 -120.0, %v415_v40 }
 0x48a   :  { %v479_v44 = vsel %vm450_vm8, -200.0, %v770_v43  ;;  %v478_v46 = vsel %vm450_vm8, %v477_v42, 8500.0 }
 0x48b   :  { %v483_v45 = vmax.f32 %v479_v44, %v481_v41 }
 0x48d   :  { %v484_v48 = vmin.f32 %v478_v46, %v483_v45 }
 0x48f   :  { %v486_v50 = vadd.f32 %v485_v47, %v484_v48 }
 0x491   :  { %vm488_vm9 = vcmp.lt.f32.partialorder %v486_v50, %v653_v49 }
 0x492   :  { %v489_v51 = vsel %vm488_vm9, 800.0, %v415_v40 }
 0x493   :  { %v490_v33 = vmax.f32 %v489_v51, %v486_v50 }
 0x495   :  { %v491_v52 = vmin.f32 %v490_v33, 8000.0 }
 0x497   :  { %v492_v32 = vsub.f32 %v491_v52, %v485_v47 }
 0x499   :  { %vm493_vm11 = vcmp.ge.f32.partialorder %v492_v32, 800.0 }
 0x49a   :  { %v494_v53 = vsel %vm493_vm11, %v485_v47, %v491_v52 }
 0x49b   :  { %497 = vperm.xlu0 %696, %v494_v53  }
 0x49f   :  { %566 = vperm.xlu0 %696, %v436_v20  }
 0x4e6   :  { %v519_v54 = vpop.permute.xlu1 %518  ;;  %v560_v56 = vpop.permute.xlu0 %559 }
 0x4e7   :  { %v521_v2 = vsel %vm515_vm12, %v519_v54, 0.0  ;;  %v562_v10 = vsel %vm556_vm2, %v560_v56, 0.0 }
 0x4e8   :  { %v587_v0 = vrot.slane %v521_v2, 5  ;;  %v599_v19 = vrot.slane %v562_v10, 3 }
 0x4ea   :  { %v505_v55 = vpop.permute.xlu1 %504  ;;  %v512_v59 = vpop.permute.xlu0 %511 }
 0x4eb   :  { %v514_v4 = vsel %vm508_vm14, %v512_v59, 0.0  ;;  %v507_v5 = vsel %vm501_vm15, %v505_v55, 0.0 }
 0x4ec   :  { %v589_v14 = vadd.f32 %v587_v0, %v514_v4  ;;  %v583_v15 = vrot.slane %v507_v5, 2 }
 0x4ee   :  { %v546_v58 = vpop.permute.xlu1 %545  ;;  %v532_v61 = vpop.permute.xlu0 %531  ;;  %v607_v23 = vrot.slane %v589_v14, 3 }
 0x4ef   :  { %v534_v3 = vsel %vm529_vm13, %v532_v61, 0.0  ;;  %v548_v6 = vsel %vm542_vm0, %v546_v58, 0.0 }
 0x4f0   :  { %v591_v8 = vrot.slane %v534_v3, 7  ;;  %v595_v16 = vrot.slane %v548_v6, 1 }
 0x4f2   :  { %v553_v60 = vpop.permute.xlu1 %552  ;;  %v539_v63 = vpop.permute.xlu0 %538 }
 0x4f3   :  { %v541_v11 = vsel %vm535_vm3, %v539_v63, 0.0  ;;  %v555_v18 = vsel %vm549_vm5, %v553_v60, 0.0 }
 0x4f4   :  { %v597_v20 = vadd.f32 %v595_v16, %v541_v11  ;;  %v601_v24 = vadd.f32 %v599_v19, %v555_v18 }
 0x4f6   :  { %v573_v62 = vpop.permute.xlu1 %572 }
 0x4f7   :  { %v575_v12 = vsel %vm570_vm4, %v573_v62, 0.0 }
 0x4f8   :  { %v603_v38 = vrot.slane %v575_v12, 7 }
 0x4fa   :  { %v526_v1 = vpop.permute.xlu1 %525 }
 0x4fb   :  { %v528_v7 = vsel %vm522_vm1, %v526_v1, 0.0 }
 0x4fc   :  { %v593_v17 = vadd.f32 %v591_v8, %v528_v7 }
 0x4fe   :  { %v610_v25 = vadd.f32 %v597_v20, %v593_v17  ;;  %v579_v26 = vpop.permute.xlu1 %578 }
 0x4ff   :  { %v581_v30 = vsel %vm576_vm7, %v579_v26, 0.0 }
 0x500   :  { %v613_v31 = vrot.slane %v610_v25, 3 }
 0x516   :  { %v498_v9 = vpop.permute.xlu0 %497 }
 0x517   :  { %v500_v13 = vsel %vm140_vm10, %v498_v9, 0.0 }
 0x518   :  { %v585_v21 = vadd.f32 %v583_v15, %v500_v13 }
 0x51a   :  { %v567_v22 = vpop.permute.xlu0 %566  ;;  %v609_v28 = vadd.f32 %v607_v23, %v585_v21 }
 0x51b   :  { %v569_v37 = vsel %vm563_vm6, %v567_v22, 0.0 }
 0x51c   :  { %v605_v27 = vadd.f32 %v603_v38, %v569_v37  ;;  %v615_v35 = vadd.f32 %v613_v31, %v609_v28 }
 0x51e   :  { %v611_v29 = vadd.f32 %v605_v27, %v601_v24 }
 0x520   :  { %v616_v34 = vadd.f32 %v611_v29, %v581_v30 }
 0x522   :  { %v618_v36 = vrot.slane %v616_v34, 5 }
 0x524   :  { %v620_v39 = vadd.f32 %v618_v36, %v615_v35 }
 0x526   :  { %621 = vst [vmem:[#allocation7] sm:$0x1] %v620_v39 }
 0x527   :  { %744 = shalt.err (!%p741_p5)
}
 0x528   :  { %631 = dma.vmem_to_hbm [thread:$0]  %s629_s25, 16, %s888_s2, [#allocation4]  }
 0x529   :  { %757 = dma.done.wait [#allocation4], 16  }
 0x52a   :  { %758 = vsyncadd [#allocation4], 4294967280 }
 0x52b   :  { %635 = vsyncpa [#allocation3], 1 }
 0x52c   :  { %636 = vsyncpa [#allocation4], 1 }
 0x52d   :  { %637 = vsyncpa [#allocation5], 1 }

</bundles_post_ra>
